<compile_context>
chip_gen: v7x
topology: tpu7x:2x2x1
jax: 0.10.0
libtpu: 0.0.40
codegen_flags: <defaults>
</compile_context>

<pallas_src>
import jax
import jax.numpy as jnp
from jax import lax
from jax.experimental import pallas as pl
from jax.experimental.pallas import tpu as pltpu


def patch_embed_kernel(x_ref, w_ref, b_ref, o_ref, xp_ref, lhs_ref):
    """One image: 3x3 same-conv as a single im2col matmul.

    x_ref  : (H, W, C)       NHWC image for this grid step (batch dim squeezed)
    w_ref  : (Kp, Dp)        weights, rows ordered (kh, kw, c) in [0, 9*C); rest zero
    b_ref  : (1, Dp)         bias, zero-padded to Dp
    o_ref  : (H*W, Dp)       flat lane-dense output rows
    xp_ref : (H+2, W+16, C)  zero-halo scratch, interior at sublane offset 8
    lhs_ref: (H*W, Kp)       im2col LHS scratch (taps packed into first 9*C lanes)
    """
    H, W, C = x_ref.shape
    HW, Kp = lhs_ref.shape
    dt = xp_ref.dtype

    # padding=1 halo: zero only the ring the taps actually read (rows 0 / H+1 over
    # columns [7, W+9), and columns 7 / W+8 over rows [1, H+1)).  Re-done every
    # step because the batch axis is "parallel" (megacore-safe; see header note).
    xp_ref[0:1, 7:9 + W, :] = jnp.zeros((1, W + 2, C), dt)
    xp_ref[H + 1:H + 2, 7:9 + W, :] = jnp.zeros((1, W + 2, C), dt)
    xp_ref[1:H + 1, 7:8, :] = jnp.zeros((H, 1, C), dt)
    xp_ref[1:H + 1, 8 + W:9 + W, :] = jnp.zeros((H, 1, C), dt)
    # Image interior at row offset 1 / sublane-aligned column offset 8.
    xp_ref[1:H + 1, 8:8 + W, :] = x_ref[...]

    # The padded K columns multiply zero weight rows, but uninitialized VMEM may
    # hold NaN/Inf bit patterns (0 * NaN = NaN), so keep the tail zeroed.
    if Kp > 9 * C:
        lhs_ref[:, 9 * C:] = jnp.zeros((HW, Kp - 9 * C), dt)

    # im2col: write the 9 shifted taps at static lane offsets, (kh, kw, c) order
    # matching w_ref's rows.
    # TODO(synk): the kw=0 / kw=2 windows (offsets 7 / 9) are sublane-unaligned
    # loads; deriving them from the aligned kw=1 window with pltpu.roll would move
    # that realignment onto the idle XLU, but sublane rolls of (H, W+16, C<128)
    # tiles are not reliably lowered, so the plain slices are kept.
    for kh in range(3):
        for kw in range(3):
            t = kh * 3 + kw
            tap = xp_ref[kh:kh + H, 7 + kw:7 + kw + W, :]        # (H, W, C)
            lhs_ref[:, t * C:(t + 1) * C] = tap.reshape(HW, C)

    # Single MXU matmul with f32 accumulation; bias added in f32.
    acc = jnp.dot(lhs_ref[...], w_ref[...], preferred_element_type=jnp.float32)
    acc = acc + b_ref[...].astype(jnp.float32)
    o_ref[...] = acc.astype(o_ref.dtype)


def _round_up(x, m):
    return (x + m - 1) // m * m


def prepare_patch_embed_params(w_oihw, bias, *, lane=128):
    """Hoisted parameter prep (once at init): OIHW -> padded (Kp, Dp) im2col weights."""
    D, C, KH, KW = w_oihw.shape
    assert (KH, KW) == (3, 3)
    K = KH * KW * C
    Kp, Dp = _round_up(K, lane), _round_up(D, lane)
    w2d = jnp.transpose(w_oihw, (2, 3, 1, 0)).reshape(K, D)      # rows (kh, kw, c)
    w2d = jnp.pad(w2d, ((0, Kp - K), (0, Dp - D)))               # lane-dense N, padded K
    b2d = jnp.pad(bias.reshape(1, D), ((0, 0), (0, Dp - D)))
    return w2d, b2d, D


def _pos_table(b, h, w, dtype):
    # pos[..., 0] = column index, pos[..., 1] = row index (torch.meshgrid 'ij').
    # Constant-folds under jit; not lru_cached so it never pins a stale device.
    # NOTE: for bf16 features with H or W > 256 the integer coords would round.
    ys, xs = jnp.meshgrid(jnp.arange(h), jnp.arange(w), indexing="ij")
    pos = jnp.stack([xs, ys], axis=-1).astype(dtype)             # (h, w, 2)
    return jnp.broadcast_to(pos[None], (b, h, w, 2)).reshape(b, h * w, 2)


def patch_embed_forward(x_nchw, params):
    """Replicates PatchEmbed.forward (norm_layer=None): returns (pos, feat, None)."""
    w2d, b2d, D = params
    B, C, H, W = x_nchw.shape
    Kp, Dp = w2d.shape

    # Layout glue: PyTorch hands us NCHW; the im2col matmul wants NHWC.
    # TODO(synk): accept NHWC from the producer to drop this HBM relayout pass
    # (it costs roughly as much HBM traffic as the kernel itself at small C).
    x_nhwc = jnp.transpose(x_nchw, (0, 2, 3, 1))

    # TODO(synk): torch-side NaN/Inf assert guards are host checks; not replicated.
    # TODO(synk): for ViT-scale H*W, add a halo-aware row-tile grid axis and pick
    # the M-tile per generation (v7x: smaller tiles / 64 MiB VMEM, both cores;
    # v6e/v5e: larger tiles, N-tile of 256/128) with vmem_limit_bytes budgeted.
    feat_pad = pl.pallas_call(
        patch_embed_kernel,
        out_shape=jax.ShapeDtypeStruct((B, H * W, Dp), x_nchw.dtype),
        grid_spec=pltpu.PrefetchScalarGridSpec(
            num_scalar_prefetch=0,
            grid=(B,),
            in_specs=[
                pl.BlockSpec((None, H, W, C), lambda b: (b, 0, 0, 0)),
                pl.BlockSpec((Kp, Dp), lambda b: (0, 0)),        # weights resident
                pl.BlockSpec((1, Dp), lambda b: (0, 0)),         # bias resident
            ],
            out_specs=pl.BlockSpec((None, H * W, Dp), lambda b: (b, 0, 0)),
            scratch_shapes=[
                pltpu.VMEM((H + 2, W + 16, C), x_nchw.dtype),    # halo image
                pltpu.VMEM((H * W, Kp), x_nchw.dtype),           # im2col LHS
            ],
        ),
        compiler_params=pltpu.CompilerParams(
            dimension_semantics=("parallel",)),                  # v7x: shard batch on both TCs
    )(x_nhwc, w2d, b2d)

    feat = feat_pad if Dp == D else feat_pad[:, :, :D]           # drop N padding lanes
    feat = feat.reshape(B, H * W, D)
    pos = _pos_table(B, H, W, feat.dtype)
    return pos, feat, None


def _reference_conv(x_nchw, w_oihw, bias):
    y = lax.conv_general_dilated(
        x_nchw, w_oihw, window_strides=(1, 1), padding=((1, 1), (1, 1)),
        dimension_numbers=("NCHW", "OIHW", "NCHW"))
    y = y + bias[None, :, None, None]
    B, D, H, W = y.shape
    return y.reshape(B, D, H * W).transpose(0, 2, 1)             # flatten(2).transpose(1,2)


if __name__ == "__main__":
    key = jax.random.PRNGKey(0)
    k_x, k_w, k_b = jax.random.split(key, 3)

    # Small shapes consistent with the module: B=2, in_chans=4, H=W=16, embed_dim=32
    B, C, H, W, D = 2, 4, 16, 16, 32

    x = jax.random.normal(k_x, (B, C, H, W), dtype=jnp.float32)

    # Deterministic Conv2d-style init (kaiming-uniform bound = 1/sqrt(fan_in))
    fan_in = C * 3 * 3
    bound = 1.0 / (fan_in ** 0.5)
    w = jax.random.uniform(k_w, (D, C, 3, 3), minval=-bound, maxval=bound,
                           dtype=jnp.float32)
    b = jax.random.uniform(k_b, (D,), minval=-bound, maxval=bound,
                           dtype=jnp.float32)

    params = prepare_patch_embed_params(w, b)        # hoisted: done once at init
    pos, feat, none_out = patch_embed_forward(x, params)
    jax.block_until_ready(feat)
    jax.block_until_ready(pos)

    # Correctness check against pure-JAX reference conv.
    ref = _reference_conv(x, w, b)
    assert feat.shape == (B, H * W, D)
    assert pos.shape == (B, H * W, 2)
    assert none_out is None
    assert jnp.allclose(feat, ref, atol=1e-4, rtol=1e-4), \
        float(jnp.max(jnp.abs(feat - ref)))
    # pos semantics: channel 0 = column index, channel 1 = row index
    assert jnp.allclose(pos[0, :, 0], jnp.tile(jnp.arange(W), H).astype(pos.dtype))
    assert jnp.allclose(pos[0, :, 1], jnp.repeat(jnp.arange(H), W).astype(pos.dtype))

    print("KERNEL_OK")
</pallas_src>

<mosaic_0001>
module attributes {stable_mosaic.version = 11 : i64} {
  func.func @patch_embed_kernel(%arg0: i32, %arg1: memref<1x16x16x4xf32, #tpu.memory_space<vmem>>, %arg2: memref<128x128xf32, #tpu.memory_space<vmem>>, %arg3: memref<1x128xf32, #tpu.memory_space<vmem>>, %arg4: memref<1x256x128xf32, #tpu.memory_space<vmem>>, %arg5: memref<18x32x4xf32, #tpu.memory_space<vmem>>, %arg6: memref<256x128xf32, #tpu.memory_space<vmem>>) attributes {dimension_semantics = [#tpu.dimension_semantics<parallel>], iteration_bounds = array<i64: 2>, scalar_prefetch = 0 : i64, scratch_operands = 2 : i64, tpu.core_type = #tpu.core_type<tc>, window_params = [{transform_indices = @transform_0, window_bounds = array<i64: 1, 16, 16, 4>}, {pipeline_mode = #tpu.pipeline_mode<synchronous>, transform_indices = @transform_1, window_bounds = array<i64: 128, 128>}, {pipeline_mode = #tpu.pipeline_mode<synchronous>, transform_indices = @transform_2, window_bounds = array<i64: 1, 128>}, {transform_indices = @transform_3, window_bounds = array<i64: 1, 256, 128>}]} {
    %cst = arith.constant 0.000000e+00 : f32
    %0 = vector.broadcast %cst : f32 to vector<1x18x4xf32>
    %c0 = arith.constant 0 : index
    %c7 = arith.constant 7 : index
    %c0_0 = arith.constant 0 : index
    %1 = vector.load %arg5[%c0, %c7, %c0_0] : memref<18x32x4xf32, #tpu.memory_space<vmem>>, vector<1x18x4xf32>
    tpu.vector_store %arg5[%c0, %c7, %c0_0], %0 {strides = array<i32>} : memref<18x32x4xf32, #tpu.memory_space<vmem>>, vector<1x18x4xf32>,
    %cst_1 = arith.constant 0.000000e+00 : f32
    %2 = vector.broadcast %cst_1 : f32 to vector<1x18x4xf32>
    %c17 = arith.constant 17 : index
    %c7_2 = arith.constant 7 : index
    %c0_3 = arith.constant 0 : index
    %3 = vector.load %arg5[%c17, %c7_2, %c0_3] : memref<18x32x4xf32, #tpu.memory_space<vmem>>, vector<1x18x4xf32>
    tpu.vector_store %arg5[%c17, %c7_2, %c0_3], %2 {strides = array<i32>} : memref<18x32x4xf32, #tpu.memory_space<vmem>>, vector<1x18x4xf32>,
    %cst_4 = arith.constant 0.000000e+00 : f32
    %4 = vector.broadcast %cst_4 : f32 to vector<16x1x4xf32>
    %c1 = arith.constant 1 : index
    %c7_5 = arith.constant 7 : index
    %c0_6 = arith.constant 0 : index
    %5 = vector.load %arg5[%c1, %c7_5, %c0_6] : memref<18x32x4xf32, #tpu.memory_space<vmem>>, vector<16x1x4xf32>
    tpu.vector_store %arg5[%c1, %c7_5, %c0_6], %4 {strides = array<i32>} : memref<18x32x4xf32, #tpu.memory_space<vmem>>, vector<16x1x4xf32>,
    %cst_7 = arith.constant 0.000000e+00 : f32
    %6 = vector.broadcast %cst_7 : f32 to vector<16x1x4xf32>
    %c1_8 = arith.constant 1 : index
    %c24 = arith.constant 24 : index
    %c0_9 = arith.constant 0 : index
    %7 = vector.load %arg5[%c1_8, %c24, %c0_9] : memref<18x32x4xf32, #tpu.memory_space<vmem>>, vector<16x1x4xf32>
    tpu.vector_store %arg5[%c1_8, %c24, %c0_9], %6 {strides = array<i32>} : memref<18x32x4xf32, #tpu.memory_space<vmem>>, vector<16x1x4xf32>,
    %c0_10 = arith.constant 0 : index
    %c0_11 = arith.constant 0 : index
    %c0_12 = arith.constant 0 : index
    %c0_13 = arith.constant 0 : index
    %8 = vector.load %arg1[%c0_10, %c0_11, %c0_12, %c0_13] : memref<1x16x16x4xf32, #tpu.memory_space<vmem>>, vector<1x16x16x4xf32>
    %9 = vector.shape_cast %8 : vector<1x16x16x4xf32> to vector<16x16x4xf32>
    %c1_14 = arith.constant 1 : index
    %c8 = arith.constant 8 : index
    %c0_15 = arith.constant 0 : index
    %10 = vector.load %arg5[%c1_14, %c8, %c0_15] : memref<18x32x4xf32, #tpu.memory_space<vmem>>, vector<16x16x4xf32>
    tpu.vector_store %arg5[%c1_14, %c8, %c0_15], %9 {strides = array<i32>} : memref<18x32x4xf32, #tpu.memory_space<vmem>>, vector<16x16x4xf32>,
    %cst_16 = arith.constant 0.000000e+00 : f32
    %11 = vector.broadcast %cst_16 : f32 to vector<256x92xf32>
    %c0_17 = arith.constant 0 : index
    %c36 = arith.constant 36 : index
    %12 = vector.load %arg6[%c0_17, %c36] : memref<256x128xf32, #tpu.memory_space<vmem>>, vector<256x92xf32>
    tpu.vector_store %arg6[%c0_17, %c36], %11 {strides = array<i32>} : memref<256x128xf32, #tpu.memory_space<vmem>>, vector<256x92xf32>,
    %c0_18 = arith.constant 0 : index
    %c7_19 = arith.constant 7 : index
    %c0_20 = arith.constant 0 : index
    %13 = vector.load %arg5[%c0_18, %c7_19, %c0_20] : memref<18x32x4xf32, #tpu.memory_space<vmem>>, vector<16x16x4xf32>
    %14 = vector.shape_cast %13 : vector<16x16x4xf32> to vector<256x4xf32>
    %c0_21 = arith.constant 0 : index
    %c0_22 = arith.constant 0 : index
    %15 = vector.load %arg6[%c0_21, %c0_22] : memref<256x128xf32, #tpu.memory_space<vmem>>, vector<256x4xf32>
    tpu.vector_store %arg6[%c0_21, %c0_22], %14 {strides = array<i32>} : memref<256x128xf32, #tpu.memory_space<vmem>>, vector<256x4xf32>,
    %c0_23 = arith.constant 0 : index
    %c8_24 = arith.constant 8 : index
    %c0_25 = arith.constant 0 : index
    %16 = vector.load %arg5[%c0_23, %c8_24, %c0_25] : memref<18x32x4xf32, #tpu.memory_space<vmem>>, vector<16x16x4xf32>
    %17 = vector.shape_cast %16 : vector<16x16x4xf32> to vector<256x4xf32>
    %c0_26 = arith.constant 0 : index
    %c4 = arith.constant 4 : index
    %18 = vector.load %arg6[%c0_26, %c4] : memref<256x128xf32, #tpu.memory_space<vmem>>, vector<256x4xf32>
    tpu.vector_store %arg6[%c0_26, %c4], %17 {strides = array<i32>} : memref<256x128xf32, #tpu.memory_space<vmem>>, vector<256x4xf32>,
    %c0_27 = arith.constant 0 : index
    %c9 = arith.constant 9 : index
    %c0_28 = arith.constant 0 : index
    %19 = vector.load %arg5[%c0_27, %c9, %c0_28] : memref<18x32x4xf32, #tpu.memory_space<vmem>>, vector<16x16x4xf32>
    %20 = vector.shape_cast %19 : vector<16x16x4xf32> to vector<256x4xf32>
    %c0_29 = arith.constant 0 : index
    %c8_30 = arith.constant 8 : index
    %21 = vector.load %arg6[%c0_29, %c8_30] : memref<256x128xf32, #tpu.memory_space<vmem>>, vector<256x4xf32>
    tpu.vector_store %arg6[%c0_29, %c8_30], %20 {strides = array<i32>} : memref<256x128xf32, #tpu.memory_space<vmem>>, vector<256x4xf32>,
    %c1_31 = arith.constant 1 : index
    %c7_32 = arith.constant 7 : index
    %c0_33 = arith.constant 0 : index
    %22 = vector.load %arg5[%c1_31, %c7_32, %c0_33] : memref<18x32x4xf32, #tpu.memory_space<vmem>>, vector<16x16x4xf32>
    %23 = vector.shape_cast %22 : vector<16x16x4xf32> to vector<256x4xf32>
    %c0_34 = arith.constant 0 : index
    %c12 = arith.constant 12 : index
    %24 = vector.load %arg6[%c0_34, %c12] : memref<256x128xf32, #tpu.memory_space<vmem>>, vector<256x4xf32>
    tpu.vector_store %arg6[%c0_34, %c12], %23 {strides = array<i32>} : memref<256x128xf32, #tpu.memory_space<vmem>>, vector<256x4xf32>,
    %c1_35 = arith.constant 1 : index
    %c8_36 = arith.constant 8 : index
    %c0_37 = arith.constant 0 : index
    %25 = vector.load %arg5[%c1_35, %c8_36, %c0_37] : memref<18x32x4xf32, #tpu.memory_space<vmem>>, vector<16x16x4xf32>
    %26 = vector.shape_cast %25 : vector<16x16x4xf32> to vector<256x4xf32>
    %c0_38 = arith.constant 0 : index
    %c16 = arith.constant 16 : index
    %27 = vector.load %arg6[%c0_38, %c16] : memref<256x128xf32, #tpu.memory_space<vmem>>, vector<256x4xf32>
    tpu.vector_store %arg6[%c0_38, %c16], %26 {strides = array<i32>} : memref<256x128xf32, #tpu.memory_space<vmem>>, vector<256x4xf32>,
    %c1_39 = arith.constant 1 : index
    %c9_40 = arith.constant 9 : index
    %c0_41 = arith.constant 0 : index
    %28 = vector.load %arg5[%c1_39, %c9_40, %c0_41] : memref<18x32x4xf32, #tpu.memory_space<vmem>>, vector<16x16x4xf32>
    %29 = vector.shape_cast %28 : vector<16x16x4xf32> to vector<256x4xf32>
    %c0_42 = arith.constant 0 : index
    %c20 = arith.constant 20 : index
    %30 = vector.load %arg6[%c0_42, %c20] : memref<256x128xf32, #tpu.memory_space<vmem>>, vector<256x4xf32>
    tpu.vector_store %arg6[%c0_42, %c20], %29 {strides = array<i32>} : memref<256x128xf32, #tpu.memory_space<vmem>>, vector<256x4xf32>,
    %c2 = arith.constant 2 : index
    %c7_43 = arith.constant 7 : index
    %c0_44 = arith.constant 0 : index
    %31 = vector.load %arg5[%c2, %c7_43, %c0_44] : memref<18x32x4xf32, #tpu.memory_space<vmem>>, vector<16x16x4xf32>
    %32 = vector.shape_cast %31 : vector<16x16x4xf32> to vector<256x4xf32>
    %c0_45 = arith.constant 0 : index
    %c24_46 = arith.constant 24 : index
    %33 = vector.load %arg6[%c0_45, %c24_46] : memref<256x128xf32, #tpu.memory_space<vmem>>, vector<256x4xf32>
    tpu.vector_store %arg6[%c0_45, %c24_46], %32 {strides = array<i32>} : memref<256x128xf32, #tpu.memory_space<vmem>>, vector<256x4xf32>,
    %c2_47 = arith.constant 2 : index
    %c8_48 = arith.constant 8 : index
    %c0_49 = arith.constant 0 : index
    %34 = vector.load %arg5[%c2_47, %c8_48, %c0_49] : memref<18x32x4xf32, #tpu.memory_space<vmem>>, vector<16x16x4xf32>
    %35 = vector.shape_cast %34 : vector<16x16x4xf32> to vector<256x4xf32>
    %c0_50 = arith.constant 0 : index
    %c28 = arith.constant 28 : index
    %36 = vector.load %arg6[%c0_50, %c28] : memref<256x128xf32, #tpu.memory_space<vmem>>, vector<256x4xf32>
    tpu.vector_store %arg6[%c0_50, %c28], %35 {strides = array<i32>} : memref<256x128xf32, #tpu.memory_space<vmem>>, vector<256x4xf32>,
    %c2_51 = arith.constant 2 : index
    %c9_52 = arith.constant 9 : index
    %c0_53 = arith.constant 0 : index
    %37 = vector.load %arg5[%c2_51, %c9_52, %c0_53] : memref<18x32x4xf32, #tpu.memory_space<vmem>>, vector<16x16x4xf32>
    %38 = vector.shape_cast %37 : vector<16x16x4xf32> to vector<256x4xf32>
    %c0_54 = arith.constant 0 : index
    %c32 = arith.constant 32 : index
    %39 = vector.load %arg6[%c0_54, %c32] : memref<256x128xf32, #tpu.memory_space<vmem>>, vector<256x4xf32>
    tpu.vector_store %arg6[%c0_54, %c32], %38 {strides = array<i32>} : memref<256x128xf32, #tpu.memory_space<vmem>>, vector<256x4xf32>,
    %c0_55 = arith.constant 0 : index
    %c0_56 = arith.constant 0 : index
    %40 = vector.load %arg6[%c0_55, %c0_56] : memref<256x128xf32, #tpu.memory_space<vmem>>, vector<256x128xf32>
    %c0_57 = arith.constant 0 : index
    %c0_58 = arith.constant 0 : index
    %41 = vector.load %arg2[%c0_57, %c0_58] : memref<128x128xf32, #tpu.memory_space<vmem>>, vector<128x128xf32>
    %cst_59 = arith.constant dense<0.000000e+00> : vector<256x128xf32>
    %42 = tpu.matmul %40, %41, %cst_59 {dimension_numbers = #tpu.dot_dimension_numbers<[1], [0], [0], [1], [0, 0, 1, 1], [], []>} : vector<256x128xf32>, vector<128x128xf32>, vector<256x128xf32> -> vector<256x128xf32>
    %c0_60 = arith.constant 0 : index
    %c0_61 = arith.constant 0 : index
    %43 = vector.load %arg3[%c0_60, %c0_61] : memref<1x128xf32, #tpu.memory_space<vmem>>, vector<1x128xf32>
    %44 = vector.broadcast %43 : vector<1x128xf32> to vector<256x128xf32>
    %45 = arith.addf %42, %44 : vector<256x128xf32>
    %c0_62 = arith.constant 0 : index
    %c0_63 = arith.constant 0 : index
    %c0_64 = arith.constant 0 : index
    %46 = vector.load %arg4[%c0_62, %c0_63, %c0_64] : memref<1x256x128xf32, #tpu.memory_space<vmem>>, vector<1x256x128xf32>
    %47 = vector.shape_cast %46 : vector<1x256x128xf32> to vector<256x128xf32>
    %48 = vector.shape_cast %45 : vector<256x128xf32> to vector<1x256x128xf32>
    tpu.vector_store %arg4[%c0_62, %c0_63, %c0_64], %48 {strides = array<i32>} : memref<1x256x128xf32, #tpu.memory_space<vmem>>, vector<1x256x128xf32>,
    return
  }
  func.func @transform_0(%arg0: i32) -> (i32, i32, i32, i32) {
    %c0_i32 = arith.constant 0 : i32
    %c0_i32_0 = arith.constant 0 : i32
    %c0_i32_1 = arith.constant 0 : i32
    %c0_i32_2 = arith.constant 0 : i32
    return %arg0, %c0_i32, %c0_i32_0, %c0_i32_1 : i32, i32, i32, i32
  }
  func.func @transform_1(%arg0: i32) -> (i32, i32) {
    %c0_i32 = arith.constant 0 : i32
    %c0_i32_0 = arith.constant 0 : i32
    %c0_i32_1 = arith.constant 0 : i32
    return %c0_i32, %c0_i32_0 : i32, i32
  }
  func.func @transform_2(%arg0: i32) -> (i32, i32) {
    %c0_i32 = arith.constant 0 : i32
    %c0_i32_0 = arith.constant 0 : i32
    %c0_i32_1 = arith.constant 0 : i32
    return %c0_i32, %c0_i32_0 : i32, i32
  }
  func.func @transform_3(%arg0: i32) -> (i32, i32, i32) {
    %c0_i32 = arith.constant 0 : i32
    %c0_i32_0 = arith.constant 0 : i32
    %c0_i32_1 = arith.constant 0 : i32
    return %arg0, %c0_i32, %c0_i32_0 : i32, i32, i32
  }
}

</mosaic_0001>

<bundles_post_ra>
// kernel: tpu_custom_call.1
= control target key start
LH: loop header
LB: loop body
LE: loop exit
PB: predicated region body
PF: predicated region fallthrough
CT: control target
= control target key end

     0   :  { %8 = vsyncpa [#allocation5], 0  ;;  %s3851_s0 = inlined_call_operand.vmem [shape: f32[2,16,16,4], index: 0, kind: input, shape index: {}]   ;;  %s3852_s1 = inlined_call_operand.vmem [shape: f32[128,128], index: 1, kind: input, shape index: {}]   ;;  %s3853_s2 = inlined_call_operand.vmem [shape: f32[1,128], index: 2, kind: input, shape index: {}]   ;;  %s3854_s3 = inlined_call_operand.hbm [shape: f32[2,256,128], index: 3, kind: output, shape index: {}]  }
   0x1   :  { %10 = vsyncpa [#allocation5 + $0x1], 0  ;;  %s2641_s12 = smov 0   ;;  %s2643_s13 = smov 0  }
   0x2   :  { %s2645_s14 = smov 0   ;;  %s2647_s15 = smov 0  }
   0x3 LB: > { %s2662_s16 = sadd.s32 4294967295, %s2608_s15   ;;  %s2306_s17 = sadd.s32 4294967294, %s2608_s15   ;;  %s2608_s15 = sphi %s2647_s15, %s3860_s15   ;;  %s2604_s14 = sphi %s2645_s14, %s3859_s14   ;;  %s2600_s13 = sphi %s2643_s13, %s3858_s13   ;;  %s2596_s12 = sphi %s2641_s12, %s3857_s12  }
   0x4   : > { %s2666_s18 = sadd.s32 1, %s2608_s15   ;;  %s91_s19 = sadd.s32 1, %s2604_s14 }
   0x5   : > { %s88_s20 = ssub.s32 %s2608_s15, %s2666_s18  ;;  %p101_p0 = scmp.ne.s32.totalorder %s2604_s14, %s2600_s13 }
   0x6   : > { %p89_p1 = scmp.eq.s32.totalorder %s88_s20, 0  ;;  %p102_p2 = scmp.eq.s32.totalorder %s2662_s16, 1 }
   0x7   : > { %p107_p3 = scmp.ne.s32.totalorder %s2600_s13, %s2596_s12  ;;  %p108_p4 = scmp.eq.s32.totalorder %s2306_s17, 1 }
   0x8   : > { %s2677_s21 = scalar_select %p89_p1, %s2604_s14, %s91_s19  }
   0x9   : > { %p2679_p5 = por %p102_p2, %p101_p0  ;;  %p2683_p6 = por %p108_p4, %p107_p3 }
   0xa   : > { %p2309_p7 = scmp.ge.s32.totalorder %s2608_s15, 1  ;;  %p140_p8 = scmp.lt.s32.totalorder %s2608_s15, 3 }
   0xc   : > { %p141_p9 = pnand %p2309_p7, %p140_p8 }
   0xd   : > { %vm169_vm0 = vcmask (!%p141_p9), 31744   ;;  %p164_p10 = scmp.lt.s32.totalorder (!%p141_p9), %s2662_s16, 1  ;;  %vm172_vm1 = vcmask (!%p141_p9), 25600   ;;  %vm179_vm2 = vcmask (!%p141_p9), 24576   ;;  %v2610_v0 = vmov (!%p141_p9), 0.0   ;;  %s2611_s29 = smov (!%p141_p9), 4  }
   0xe   : > { %144 = sbr.rel (%p141_p9) target bundleno = 918 (0x396), region = 32  ;;  %170 = vst.msk [vmem:[#allocation2 + $0x7] sm:$0xff] (!%p141_p9), %vm169_vm0, %v2610_v0  ;;  %171 = vst.msk [vmem:[#allocation2 + $0xf] sm:$0xff] (!%p141_p9), %vm169_vm0, %v2610_v0  ;;  %vm276_vm3 = vcmask (!%p141_p9), 1047840   ;;  %s2612_s30 = smov (!%p141_p9), 8   ;;  %vm533_vm4 = vcmask (!%p141_p9), 64544  }
   0xf   : > { %175 = vst.msk [vmem:[#allocation2 + $0x227] sm:$0xff] (!%p141_p9), %vm169_vm0, %v2610_v0  ;;  %176 = vst.msk [vmem:[#allocation2 + $0x22f] sm:$0xff] (!%p141_p9), %vm169_vm0, %v2610_v0  ;;  %s2613_s4 = smov (!%p141_p9), 12   ;;  %vm726_vm5 = vcmask (!%p141_p9), 97344   ;;  %s2614_s5 = smov (!%p141_p9), 16   ;;  %vm919_vm6 = vcmask (!%p141_p9), 130144  }
  0x10   : > { %173 = vst.msk [vmem:[#allocation2 + $0x17] sm:$0x3] (!%p141_p9), %vm172_vm1, %v2610_v0  ;;  %177 = vst.msk [vmem:[#allocation2 + $0x237] sm:$0x3] (!%p141_p9), %vm172_vm1, %v2610_v0  ;;  %s2615_s6 = smov (!%p141_p9), 20   ;;  %s2617_s9 = smov (!%p141_p9), 28  }
  0x11   : > { %196 = vst.msk [vmem:[#allocation2 + $0x38] sm:$0x1] (!%p141_p9), %vm179_vm2, %v2610_v0  ;;  %180 = vst.msk [vmem:[#allocation2 + $0x27] sm:$0x1] (!%p141_p9), %vm179_vm2, %v2610_v0  ;;  %vm1112_vm7 = vcmask (!%p141_p9), 162944   ;;  %vm1305_vm8 = vcmask (!%p141_p9), 195744  }
  0x12   : > { %181 = vst.msk [vmem:[#allocation2 + $0x47] sm:$0x1] (!%p141_p9), %vm179_vm2, %v2610_v0  ;;  %182 = vst.msk [vmem:[#allocation2 + $0x67] sm:$0x1] (!%p141_p9), %vm179_vm2, %v2610_v0  ;;  %vm1499_vm9 = vcmask (!%p141_p9), 228544   ;;  %vm1692_vm10 = vcmask (!%p141_p9), 261344  }
  0x13   : > { %183 = vst.msk [vmem:[#allocation2 + $0x87] sm:$0x1] (!%p141_p9), %vm179_vm2, %v2610_v0  ;;  %184 = vst.msk [vmem:[#allocation2 + $0xa7] sm:$0x1] (!%p141_p9), %vm179_vm2, %v2610_v0  ;;  %vm1885_vm11 = vcmask (!%p141_p9), 294144   ;;  %s2619_s7 = smov (!%p141_p9), [#allocation4]  }
  0x14   : > { %185 = vst.msk [vmem:[#allocation2 + $0xc7] sm:$0x1] (!%p141_p9), %vm179_vm2, %v2610_v0  ;;  %186 = vst.msk [vmem:[#allocation2 + $0xe7] sm:$0x1] (!%p141_p9), %vm179_vm2, %v2610_v0  ;;  %s2550_s8 = sshll.u32 (!%p141_p9), %s2619_s7, 4  ;;  %s2551_s8 = int_to_ptr.vmem [resolvable:$false] %s2550_s8 }
  0x15   : > { %187 = vst.msk [vmem:[#allocation2 + $0x107] sm:$0x1] %vm179_vm2, %v2610_v0  ;;  %188 = vst.msk [vmem:[#allocation2 + $0x127] sm:$0x1] %vm179_vm2, %v2610_v0  ;;  %s2767_s24 = scalar_select %p164_p10, %s2662_s16, 1  ;;  %v373_v7 = vld [vmem:[#allocation2 + $0x8] sm:$0xff] }
  0x16   : > { %189 = vst.msk [vmem:[#allocation2 + $0x147] sm:$0x1] %vm179_vm2, %v2610_v0  ;;  %190 = vst.msk [vmem:[#allocation2 + $0x167] sm:$0x1] %vm179_vm2, %v2610_v0  ;;  %437 = vrot.lane.b32.xlu0 %v373_v7, %s2611_s29  ;;  %v309_v45 = vld [vmem:[#allocation2 + $0x7] sm:$0xff]  ;;  %v310_v48 = vld [vmem:[#allocation2 + $0xf] sm:$0xff] }
  0x17   : > { %191 = vst.msk [vmem:[#allocation2 + $0x187] sm:$0x1] %vm179_vm2, %v2610_v0  ;;  %192 = vst.msk [vmem:[#allocation2 + $0x1a7] sm:$0x1] %vm179_vm2, %v2610_v0  ;;  %s2319_s25 = sshll.u32 %s2767_s24, 8  ;;  %v374_v8 = vld [vmem:[#allocation2 + $0x10] sm:$0xff] }
  0x18   : > { %193 = vst.msk [vmem:[#allocation2 + $0x1c7] sm:$0x1] %vm179_vm2, %v2610_v0  ;;  %194 = vst.msk [vmem:[#allocation2 + $0x1e7] sm:$0x1] %vm179_vm2, %v2610_v0  ;;  %s2837_s28 = scalar_lea.vmem %s3851_s0, %s2319_s25  ;;  %s2616_s24 = smov 24  }
  0x19   : > { %195 = vst.msk [vmem:[#allocation2 + $0x207] sm:$0x1] %vm179_vm2, %v2610_v0  ;;  %197 = vst.msk [vmem:[#allocation2 + $0x58] sm:$0x1] %vm179_vm2, %v2610_v0  ;;  %v212_v1 = vld [vmem:[%s2837_s28] sm:$0xff]  ;;  %v213_v2 = vld [vmem:[%s2837_s28 + $0x8] sm:$0xff] }
  0x1a   : > { %198 = vst.msk [vmem:[#allocation2 + $0x78] sm:$0x1] %vm179_vm2, %v2610_v0  ;;  %199 = vst.msk [vmem:[#allocation2 + $0x98] sm:$0x1] %vm179_vm2, %v2610_v0  ;;  %v214_v3 = vld [vmem:[%s2837_s28 + $0x10] sm:$0xff]  ;;  %v215_v4 = vld [vmem:[%s2837_s28 + $0x18] sm:$0xff]  ;;  %439 = vrot.lane.b32.xlu0 %v374_v8, %s2611_s29 }
  0x1b   : > { %200 = vst.msk [vmem:[#allocation2 + $0xb8] sm:$0x1] %vm179_vm2, %v2610_v0  ;;  %201 = vst.msk [vmem:[#allocation2 + $0xd8] sm:$0x1] %vm179_vm2, %v2610_v0  ;;  %v216_v5 = vld [vmem:[%s2837_s28 + $0x20] sm:$0xff]  ;;  %v217_v6 = vld [vmem:[%s2837_s28 + $0x28] sm:$0xff] }
  0x1c   : > { %202 = vst.msk [vmem:[#allocation2 + $0xf8] sm:$0x1] %vm179_vm2, %v2610_v0  ;;  %203 = vst.msk [vmem:[#allocation2 + $0x118] sm:$0x1] %vm179_vm2, %v2610_v0  ;;  %v218_v9 = vld [vmem:[%s2837_s28 + $0x30] sm:$0xff]  ;;  %v219_v10 = vld [vmem:[%s2837_s28 + $0x38] sm:$0xff] }
  0x1d   : > { %204 = vst.msk [vmem:[#allocation2 + $0x138] sm:$0x1] %vm179_vm2, %v2610_v0  ;;  %205 = vst.msk [vmem:[#allocation2 + $0x158] sm:$0x1] %vm179_vm2, %v2610_v0  ;;  %v220_v11 = vld [vmem:[%s2837_s28 + $0x40] sm:$0xff]  ;;  %v221_v12 = vld [vmem:[%s2837_s28 + $0x48] sm:$0xff] }
  0x1e   : > { %206 = vst.msk [vmem:[#allocation2 + $0x178] sm:$0x1] %vm179_vm2, %v2610_v0  ;;  %207 = vst.msk [vmem:[#allocation2 + $0x198] sm:$0x1] %vm179_vm2, %v2610_v0  ;;  %v222_v13 = vld [vmem:[%s2837_s28 + $0x50] sm:$0xff]  ;;  %v223_v14 = vld [vmem:[%s2837_s28 + $0x58] sm:$0xff] }
  0x1f   : > { %208 = vst.msk [vmem:[#allocation2 + $0x1b8] sm:$0x1] %vm179_vm2, %v2610_v0  ;;  %209 = vst.msk [vmem:[#allocation2 + $0x1d8] sm:$0x1] %vm179_vm2, %v2610_v0  ;;  %v224_v15 = vld [vmem:[%s2837_s28 + $0x60] sm:$0xff]  ;;  %v225_v16 = vld [vmem:[%s2837_s28 + $0x68] sm:$0xff] }
  0x20   : > { %210 = vst.msk [vmem:[#allocation2 + $0x1f8] sm:$0x1] %vm179_vm2, %v2610_v0  ;;  %211 = vst.msk [vmem:[#allocation2 + $0x218] sm:$0x1] %vm179_vm2, %v2610_v0  ;;  %v226_v17 = vld [vmem:[%s2837_s28 + $0x70] sm:$0xff]  ;;  %v227_v18 = vld [vmem:[%s2837_s28 + $0x78] sm:$0xff] }
  0x21   : > { %277 = vst.msk [vmem:[#allocation3] sm:$0xff] %vm276_vm3, %v2610_v0  ;;  %278 = vst.msk [vmem:[#allocation3 + $0x8] sm:$0xff] %vm276_vm3, %v2610_v0  ;;  %v228_v19 = vld [vmem:[%s2837_s28 + $0x80] sm:$0xff]  ;;  %v229_v20 = vld [vmem:[%s2837_s28 + $0x88] sm:$0xff]  ;;  %s2320_s25 = sshll.u32 %s2662_s16, 12  ;;  %s2552_s10 = scalar_lea.vmem %s2551_s8, 8192 }
  0x22   : > { %279 = vst.msk [vmem:[#allocation3 + $0x10] sm:$0xff] %vm276_vm3, %v2610_v0  ;;  %280 = vst.msk [vmem:[#allocation3 + $0x18] sm:$0xff] %vm276_vm3, %v2610_v0  ;;  %v230_v21 = vld [vmem:[%s2837_s28 + $0x90] sm:$0xff]  ;;  %v231_v22 = vld [vmem:[%s2837_s28 + $0x98] sm:$0xff] }
  0x23   : > { %281 = vst.msk [vmem:[#allocation3 + $0x20] sm:$0xff] %vm276_vm3, %v2610_v0  ;;  %282 = vst.msk [vmem:[#allocation3 + $0x28] sm:$0xff] %vm276_vm3, %v2610_v0  ;;  %v232_v23 = vld [vmem:[%s2837_s28 + $0xa0] sm:$0xff]  ;;  %v233_v24 = vld [vmem:[%s2837_s28 + $0xa8] sm:$0xff] }
  0x24   : > { %283 = vst.msk [vmem:[#allocation3 + $0x30] sm:$0xff] %vm276_vm3, %v2610_v0  ;;  %284 = vst.msk [vmem:[#allocation3 + $0x38] sm:$0xff] %vm276_vm3, %v2610_v0  ;;  %v234_v28 = vld [vmem:[%s2837_s28 + $0xb0] sm:$0xff]  ;;  %v235_v29 = vld [vmem:[%s2837_s28 + $0xb8] sm:$0xff] }
  0x25   : > { %285 = vst.msk [vmem:[#allocation3 + $0x40] sm:$0xff] %vm276_vm3, %v2610_v0  ;;  %286 = vst.msk [vmem:[#allocation3 + $0x48] sm:$0xff] %vm276_vm3, %v2610_v0  ;;  %v236_v33 = vld [vmem:[%s2837_s28 + $0xc0] sm:$0xff]  ;;  %v237_v34 = vld [vmem:[%s2837_s28 + $0xc8] sm:$0xff] }
  0x26   : > { %287 = vst.msk [vmem:[#allocation3 + $0x50] sm:$0xff] %vm276_vm3, %v2610_v0  ;;  %288 = vst.msk [vmem:[#allocation3 + $0x58] sm:$0xff] %vm276_vm3, %v2610_v0  ;;  %v238_v35 = vld [vmem:[%s2837_s28 + $0xd0] sm:$0xff]  ;;  %v239_v36 = vld [vmem:[%s2837_s28 + $0xd8] sm:$0xff] }
  0x27   : > { %289 = vst.msk [vmem:[#allocation3 + $0x60] sm:$0xff] %vm276_vm3, %v2610_v0  ;;  %290 = vst.msk [vmem:[#allocation3 + $0x68] sm:$0xff] %vm276_vm3, %v2610_v0  ;;  %v240_v37 = vld [vmem:[%s2837_s28 + $0xe0] sm:$0xff]  ;;  %v241_v38 = vld [vmem:[%s2837_s28 + $0xe8] sm:$0xff] }
  0x28   : > { %291 = vst.msk [vmem:[#allocation3 + $0x70] sm:$0xff] %vm276_vm3, %v2610_v0  ;;  %292 = vst.msk [vmem:[#allocation3 + $0x78] sm:$0xff] %vm276_vm3, %v2610_v0 }
  0x29   : > { %293 = vst.msk [vmem:[#allocation3 + $0x80] sm:$0xff] %vm276_vm3, %v2610_v0  ;;  %294 = vst.msk [vmem:[#allocation3 + $0x88] sm:$0xff] %vm276_vm3, %v2610_v0 }
  0x2a   : > { %295 = vst.msk [vmem:[#allocation3 + $0x90] sm:$0xff] %vm276_vm3, %v2610_v0  ;;  %296 = vst.msk [vmem:[#allocation3 + $0x98] sm:$0xff] %vm276_vm3, %v2610_v0 }
  0x2b   : > { %297 = vst.msk [vmem:[#allocation3 + $0xa0] sm:$0xff] %vm276_vm3, %v2610_v0  ;;  %298 = vst.msk [vmem:[#allocation3 + $0xa8] sm:$0xff] %vm276_vm3, %v2610_v0 }
  0x2c   : > { %299 = vst.msk [vmem:[#allocation3 + $0xb0] sm:$0xff] %vm276_vm3, %v2610_v0  ;;  %300 = vst.msk [vmem:[#allocation3 + $0xb8] sm:$0xff] %vm276_vm3, %v2610_v0 }
  0x2d   : > { %301 = vst.msk [vmem:[#allocation3 + $0xc0] sm:$0xff] %vm276_vm3, %v2610_v0  ;;  %302 = vst.msk [vmem:[#allocation3 + $0xc8] sm:$0xff] %vm276_vm3, %v2610_v0 }
  0x2e   : > { %303 = vst.msk [vmem:[#allocation3 + $0xd0] sm:$0xff] %vm276_vm3, %v2610_v0  ;;  %304 = vst.msk [vmem:[#allocation3 + $0xd8] sm:$0xff] %vm276_vm3, %v2610_v0 }
  0x2f   : > { %305 = vst.msk [vmem:[#allocation3 + $0xe0] sm:$0xff] %vm276_vm3, %v2610_v0  ;;  %306 = vst.msk [vmem:[#allocation3 + $0xe8] sm:$0xff] %vm276_vm3, %v2610_v0 }
  0x30   : > { %307 = vst.msk [vmem:[#allocation3 + $0xf0] sm:$0xff] %vm276_vm3, %v2610_v0  ;;  %308 = vst.msk [vmem:[#allocation3 + $0xf8] sm:$0xff] %vm276_vm3, %v2610_v0 }
  0x31   : > { %244 = vst.msk [vmem:[#allocation2 + $0x28] sm:$0xff] %vm169_vm0, %v212_v1  ;;  %245 = vst.msk [vmem:[#allocation2 + $0x30] sm:$0xff] %vm169_vm0, %v213_v2 }
  0x32   : > { %246 = vst.msk [vmem:[#allocation2 + $0x48] sm:$0xff] %vm169_vm0, %v214_v3  ;;  %247 = vst.msk [vmem:[#allocation2 + $0x50] sm:$0xff] %vm169_vm0, %v215_v4 }
  0x33   : > { %248 = vst.msk [vmem:[#allocation2 + $0x68] sm:$0xff] %vm169_vm0, %v216_v5  ;;  %249 = vst.msk [vmem:[#allocation2 + $0x70] sm:$0xff] %vm169_vm0, %v217_v6 }
  0x34   : > { %250 = vst.msk [vmem:[#allocation2 + $0x88] sm:$0xff] %vm169_vm0, %v218_v9  ;;  %251 = vst.msk [vmem:[#allocation2 + $0x90] sm:$0xff] %vm169_vm0, %v219_v10 }
  0x35   : > { %252 = vst.msk [vmem:[#allocation2 + $0xa8] sm:$0xff] %vm169_vm0, %v220_v11  ;;  %253 = vst.msk [vmem:[#allocation2 + $0xb0] sm:$0xff] %vm169_vm0, %v221_v12 }
  0x36   : > { %254 = vst.msk [vmem:[#allocation2 + $0xc8] sm:$0xff] %vm169_vm0, %v222_v13  ;;  %255 = vst.msk [vmem:[#allocation2 + $0xd0] sm:$0xff] %vm169_vm0, %v223_v14 }
  0x37   : > { %256 = vst.msk [vmem:[#allocation2 + $0xe8] sm:$0xff] %vm169_vm0, %v224_v15  ;;  %257 = vst.msk [vmem:[#allocation2 + $0xf0] sm:$0xff] %vm169_vm0, %v225_v16 }
  0x38   : > { %258 = vst.msk [vmem:[#allocation2 + $0x108] sm:$0xff] %vm169_vm0, %v226_v17  ;;  %259 = vst.msk [vmem:[#allocation2 + $0x110] sm:$0xff] %vm169_vm0, %v227_v18  ;;  %v2882_v25 = vld [vmem:[#allocation2 + $0x28] sm:$0xff]  ;;  %v2891_v27 = vld [vmem:[#allocation2 + $0x30] sm:$0xff] }
  0x39   : > { %260 = vst.msk [vmem:[#allocation2 + $0x128] sm:$0xff] %vm169_vm0, %v228_v19  ;;  %261 = vst.msk [vmem:[#allocation2 + $0x130] sm:$0xff] %vm169_vm0, %v229_v20  ;;  %v2884_v26 = vld [vmem:[#allocation2 + $0x48] sm:$0xff]  ;;  %441 = vrot.lane.b32.xlu1 %v2882_v25, %s2611_s29  ;;  %v378_v31 = vld [vmem:[#allocation2 + $0x50] sm:$0xff] }
  0x3a   : > { %262 = vst.msk [vmem:[#allocation2 + $0x148] sm:$0xff] %vm169_vm0, %v230_v21  ;;  %263 = vst.msk [vmem:[#allocation2 + $0x150] sm:$0xff] %vm169_vm0, %v231_v22  ;;  %445 = vrot.lane.b32.xlu0 %v2884_v26, %s2611_s29  ;;  %v379_v30 = vld [vmem:[#allocation2 + $0x68] sm:$0xff]  ;;  %v380_v39 = vld [vmem:[#allocation2 + $0x70] sm:$0xff] }
  0x3b   : > { %264 = vst.msk [vmem:[#allocation2 + $0x168] sm:$0xff] %vm169_vm0, %v232_v23  ;;  %265 = vst.msk [vmem:[#allocation2 + $0x170] sm:$0xff] %vm169_vm0, %v233_v24  ;;  %v381_v32 = vld [vmem:[#allocation2 + $0x88] sm:$0xff]  ;;  %v382_v41 = vld [vmem:[#allocation2 + $0x90] sm:$0xff] }
  0x3c   : > { %266 = vst.msk [vmem:[#allocation2 + $0x188] sm:$0xff] %vm169_vm0, %v234_v28  ;;  %267 = vst.msk [vmem:[#allocation2 + $0x190] sm:$0xff] %vm169_vm0, %v235_v29  ;;  %v383_v40 = vld [vmem:[#allocation2 + $0xa8] sm:$0xff]  ;;  %v384_v43 = vld [vmem:[#allocation2 + $0xb0] sm:$0xff] }
  0x3d   : > { %443 = vrot.lane.b32.xlu1 %v2891_v27, %s2611_s29  ;;  %268 = vst.msk [vmem:[#allocation2 + $0x1a8] sm:$0xff] %vm169_vm0, %v236_v33  ;;  %269 = vst.msk [vmem:[#allocation2 + $0x1b0] sm:$0xff] %vm169_vm0, %v237_v34  ;;  %v385_v42 = vld [vmem:[#allocation2 + $0xc8] sm:$0xff]  ;;  %v386_v47 = vld [vmem:[#allocation2 + $0xd0] sm:$0xff] }
  0x3e   : > { %449 = vrot.lane.b32.xlu0 %v379_v30, %s2611_s29  ;;  %270 = vst.msk [vmem:[#allocation2 + $0x1c8] sm:$0xff] %vm169_vm0, %v238_v35  ;;  %271 = vst.msk [vmem:[#allocation2 + $0x1d0] sm:$0xff] %vm169_vm0, %v239_v36  ;;  %v387_v44 = vld [vmem:[#allocation2 + $0xe8] sm:$0xff]  ;;  %v388_v53 = vld [vmem:[#allocation2 + $0xf0] sm:$0xff] }
  0x3f   : > { %272 = vst.msk [vmem:[#allocation2 + $0x1e8] sm:$0xff] %vm169_vm0, %v240_v37  ;;  %273 = vst.msk [vmem:[#allocation2 + $0x1f0] sm:$0xff] %vm169_vm0, %v241_v38  ;;  %v2921_v46 = vld [vmem:[#allocation2 + $0x27] sm:$0xff]  ;;  %v2928_v49 = vld [vmem:[#allocation2 + $0x2f] sm:$0xff] }
  0x40   : > { %341 = vst.msk [vmem:[#allocation3] sm:$0xff] %vm169_vm0, %v309_v45  ;;  %343 = vst.msk [vmem:[#allocation3 + $0x10] sm:$0xff] %vm169_vm0, %v2921_v46  ;;  %v389_v50 = vld [vmem:[#allocation2 + $0x108] sm:$0xff]  ;;  %v390_v63 = vld [vmem:[#allocation2 + $0x110] sm:$0xff] }
  0x41   : > { %447 = vrot.lane.b32.xlu1 %v378_v31, %s2611_s29  ;;  %342 = vst.msk [vmem:[#allocation3 + $0x8] sm:$0xff] %vm169_vm0, %v310_v48  ;;  %344 = vst.msk [vmem:[#allocation3 + $0x18] sm:$0xff] %vm169_vm0, %v2928_v49  ;;  %v2932_v51 = vld [vmem:[#allocation2 + $0x47] sm:$0xff]  ;;  %v2934_v52 = vld [vmem:[#allocation2 + $0x4f] sm:$0xff] }
  0x42   : > { %453 = vrot.lane.b32.xlu0 %v381_v32, %s2611_s29  ;;  %345 = vst.msk [vmem:[#allocation3 + $0x20] sm:$0xff] %vm169_vm0, %v2932_v51  ;;  %346 = vst.msk [vmem:[#allocation3 + $0x28] sm:$0xff] %vm169_vm0, %v2934_v52  ;;  %v2941_v54 = vld [vmem:[#allocation2 + $0x67] sm:$0xff]  ;;  %v2943_v55 = vld [vmem:[#allocation2 + $0x6f] sm:$0xff] }
  0x43   : > { %v2945_v56 = vld [vmem:[#allocation2 + $0x128] sm:$0xff]  ;;  %347 = vst.msk [vmem:[#allocation3 + $0x30] sm:$0xff] %vm169_vm0, %v2941_v54  ;;  %348 = vst.msk [vmem:[#allocation3 + $0x38] sm:$0xff] %vm169_vm0, %v2943_v55  ;;  %v3026_v13 = vld [vmem:[#allocation2 + $0x130] sm:$0xff] }
  0x44   : > { %v2951_v57 = vld [vmem:[#allocation2 + $0x87] sm:$0xff]  ;;  %v2953_v58 = vld [vmem:[#allocation2 + $0x8f] sm:$0xff]  ;;  %v243_v33 = vld [vmem:[%s2837_s28 + $0xf8] sm:$0xff] }
  0x45   : > { %451 = vrot.lane.b32.xlu1 %v380_v39, %s2611_s29  ;;  %v2955_v59 = vld [vmem:[#allocation2 + $0xa7] sm:$0xff]  ;;  %349 = vst.msk [vmem:[#allocation3 + $0x40] sm:$0xff] %vm169_vm0, %v2951_v57  ;;  %350 = vst.msk [vmem:[#allocation3 + $0x48] sm:$0xff] %vm169_vm0, %v2953_v58  ;;  %v2964_v60 = vld [vmem:[#allocation2 + $0xaf] sm:$0xff] }
  0x46   : > { %457 = vrot.lane.b32.xlu0 %v383_v40, %s2611_s29  ;;  %351 = vst.msk [vmem:[#allocation3 + $0x50] sm:$0xff] %vm169_vm0, %v2955_v59  ;;  %v2966_v61 = vld [vmem:[#allocation2 + $0xc7] sm:$0xff]  ;;  %v2968_v62 = vld [vmem:[#allocation2 + $0xcf] sm:$0xff]  ;;  %352 = vst.msk [vmem:[#allocation3 + $0x58] sm:$0xff] %vm169_vm0, %v2964_v60 }
  0x47   : > { %353 = vst.msk [vmem:[#allocation3 + $0x60] sm:$0xff] %vm169_vm0, %v2966_v61  ;;  %354 = vst.msk [vmem:[#allocation3 + $0x68] sm:$0xff] %vm169_vm0, %v2968_v62  ;;  %v2976_v0 = vld [vmem:[#allocation2 + $0xe7] sm:$0xff]  ;;  %v2978_v1 = vld [vmem:[#allocation2 + $0xef] sm:$0xff] }
  0x48   : > { %v2980_v2 = vld [vmem:[#allocation2 + $0x107] sm:$0xff]  ;;  %355 = vst.msk [vmem:[#allocation3 + $0x70] sm:$0xff] %vm169_vm0, %v2976_v0  ;;  %356 = vst.msk [vmem:[#allocation3 + $0x78] sm:$0xff] %vm169_vm0, %v2978_v1  ;;  %v2989_v3 = vld [vmem:[#allocation2 + $0x10f] sm:$0xff] }
  0x49   : > { %455 = vrot.lane.b32.xlu1 %v382_v41, %s2611_s29  ;;  %357 = vst.msk [vmem:[#allocation3 + $0x80] sm:$0xff] %vm169_vm0, %v2980_v2  ;;  %v2991_v4 = vld [vmem:[#allocation2 + $0x127] sm:$0xff]  ;;  %v2993_v5 = vld [vmem:[#allocation2 + $0x12f] sm:$0xff]  ;;  %358 = vst.msk [vmem:[#allocation3 + $0x88] sm:$0xff] %vm169_vm0, %v2989_v3 }
  0x4a   : > { %461 = vrot.lane.b32.xlu0 %v385_v42, %s2611_s29  ;;  %359 = vst.msk [vmem:[#allocation3 + $0x90] sm:$0xff] %vm169_vm0, %v2991_v4  ;;  %360 = vst.msk [vmem:[#allocation3 + $0x98] sm:$0xff] %vm169_vm0, %v2993_v5  ;;  %v3001_v6 = vld [vmem:[#allocation2 + $0x147] sm:$0xff]  ;;  %v3003_v7 = vld [vmem:[#allocation2 + $0x14f] sm:$0xff] }
  0x4b   : > { %v3005_v8 = vld [vmem:[#allocation2 + $0x167] sm:$0xff]  ;;  %361 = vst.msk [vmem:[#allocation3 + $0xa0] sm:$0xff] %vm169_vm0, %v3001_v6  ;;  %362 = vst.msk [vmem:[#allocation3 + $0xa8] sm:$0xff] %vm169_vm0, %v3003_v7  ;;  %v3015_v9 = vld [vmem:[#allocation2 + $0x16f] sm:$0xff] }
  0x4c   : > { %363 = vst.msk [vmem:[#allocation3 + $0xb0] sm:$0xff] %vm169_vm0, %v3005_v8  ;;  %v3017_v10 = vld [vmem:[#allocation2 + $0x148] sm:$0xff]  ;;  %364 = vst.msk [vmem:[#allocation3 + $0xb8] sm:$0xff] %vm169_vm0, %v3015_v9  ;;  %v3040_v17 = vld [vmem:[#allocation2 + $0x150] sm:$0xff] }
  0x4d   : > { %459 = vrot.lane.b32.xlu1 %v384_v43, %s2611_s29  ;;  %v3022_v11 = vld [vmem:[#allocation2 + $0x187] sm:$0xff]  ;;  %v3024_v12 = vld [vmem:[#allocation2 + $0x18f] sm:$0xff]  ;;  %275 = vst.msk [vmem:[#allocation2 + $0x210] sm:$0xff] %vm169_vm0, %v243_v33 }
  0x4e   : > { %465 = vrot.lane.b32.xlu0 %v387_v44, %s2611_s29  ;;  %365 = vst.msk [vmem:[#allocation3 + $0xc0] sm:$0xff] %vm169_vm0, %v3022_v11  ;;  %366 = vst.msk [vmem:[#allocation3 + $0xc8] sm:$0xff] %vm169_vm0, %v3024_v12  ;;  %v395_v14 = vld [vmem:[#allocation2 + $0x168] sm:$0xff]  ;;  %v396_v21 = vld [vmem:[#allocation2 + $0x170] sm:$0xff] }
  0x4f   : > { %v3036_v15 = vld [vmem:[#allocation2 + $0x1a7] sm:$0xff]  ;;  %v3038_v16 = vld [vmem:[#allocation2 + $0x1af] sm:$0xff] }
  0x50   : > { %367 = vst.msk [vmem:[#allocation3 + $0xd0] sm:$0xff] %vm169_vm0, %v3036_v15  ;;  %368 = vst.msk [vmem:[#allocation3 + $0xd8] sm:$0xff] %vm169_vm0, %v3038_v16  ;;  %v397_v18 = vld [vmem:[#allocation2 + $0x188] sm:$0xff]  ;;  %v398_v28 = vld [vmem:[#allocation2 + $0x190] sm:$0xff] }
  0x51   : > { %463 = vrot.lane.b32.xlu1 %v386_v47, %s2611_s29  ;;  %v3049_v19 = vld [vmem:[#allocation2 + $0x1c7] sm:$0xff]  ;;  %v3051_v20 = vld [vmem:[#allocation2 + $0x1cf] sm:$0xff] }
  0x52   : > { %469 = vrot.lane.b32.xlu0 %v389_v50, %s2611_s29  ;;  %369 = vst.msk [vmem:[#allocation3 + $0xe0] sm:$0xff] %vm169_vm0, %v3049_v19  ;;  %370 = vst.msk [vmem:[#allocation3 + $0xe8] sm:$0xff] %vm169_vm0, %v3051_v20  ;;  %v399_v22 = vld [vmem:[#allocation2 + $0x1a8] sm:$0xff]  ;;  %v400_v30 = vld [vmem:[#allocation2 + $0x1b0] sm:$0xff] }
  0x53   : > { %v3059_v23 = vld [vmem:[#allocation2 + $0x1e7] sm:$0xff]  ;;  %v3061_v24 = vld [vmem:[#allocation2 + $0x1ef] sm:$0xff] }
  0x54   : > { %371 = vst.msk [vmem:[#allocation3 + $0xf0] sm:$0xff] %vm169_vm0, %v3059_v23  ;;  %372 = vst.msk [vmem:[#allocation3 + $0xf8] sm:$0xff] %vm169_vm0, %v3061_v24  ;;  %v401_v29 = vld [vmem:[#allocation2 + $0x1c8] sm:$0xff]  ;;  %v242_v31 = vld [vmem:[%s2837_s28 + $0xf0] sm:$0xff]  ;;  %s2618_s28 = smov 32  }
  0x55   : > { %467 = vrot.lane.b32.xlu1 %v388_v53, %s2611_s29  ;;  %v403_v32 = vld [vmem:[#allocation2 + $0x1e8] sm:$0xff]  ;;  %274 = vst.msk [vmem:[#allocation2 + $0x208] sm:$0xff] %vm169_vm0, %v242_v31  ;;  %v402_v34 = vld [vmem:[#allocation2 + $0x1d0] sm:$0xff] }
  0x56   : > { %473 = vrot.lane.b32.xlu0 %v2945_v56, %s2611_s29  ;;  %v566_v35 = vld [vmem:[#allocation2 + $0x9] sm:$0xff]  ;;  %v567_v38 = vld [vmem:[#allocation2 + $0x11] sm:$0xff] }
  0x57   : > { %v404_v36 = vld [vmem:[#allocation2 + $0x1f0] sm:$0xff] }
  0x58   : > { %v3078_v37 = vld [vmem:[#allocation2 + $0x29] sm:$0xff]  ;;  %v3086_v40 = vld [vmem:[#allocation2 + $0x31] sm:$0xff] }
  0x59   : > { %471 = vrot.lane.b32.xlu1 %v390_v63, %s2611_s29  ;;  %v3083_v39 = vld [vmem:[#allocation2 + $0x49] sm:$0xff]  ;;  %v3094_v42 = vld [vmem:[#allocation2 + $0x51] sm:$0xff] }
  0x5a   : > { %477 = vrot.lane.b32.xlu0 %v3017_v10, %s2611_s29  ;;  %v3090_v41 = vld [vmem:[#allocation2 + $0x69] sm:$0xff]  ;;  %v3100_v44 = vld [vmem:[#allocation2 + $0x71] sm:$0xff] }
  0x5b   : > { %v574_v43 = vld [vmem:[#allocation2 + $0x89] sm:$0xff]  ;;  %v575_v47 = vld [vmem:[#allocation2 + $0x91] sm:$0xff] }
  0x5c   : > { %v576_v45 = vld [vmem:[#allocation2 + $0xa9] sm:$0xff]  ;;  %v577_v50 = vld [vmem:[#allocation2 + $0xb1] sm:$0xff] }
  0x5d   : > { %475 = vrot.lane.b32.xlu1 %v3026_v13, %s2611_s29  ;;  %v578_v48 = vld [vmem:[#allocation2 + $0xc9] sm:$0xff]  ;;  %v579_v63 = vld [vmem:[#allocation2 + $0xd1] sm:$0xff] }
  0x5e   : > { %481 = vrot.lane.b32.xlu0 %v395_v14, %s2611_s29  ;;  %v580_v53 = vld [vmem:[#allocation2 + $0xe9] sm:$0xff]  ;;  %v3128_v31 = vld [vmem:[#allocation2 + $0x151] sm:$0xff] }
  0x5f   : > { %v582_v14 = vld [vmem:[#allocation2 + $0x109] sm:$0xff]  ;;  %v3136_v33 = vld [vmem:[#allocation2 + $0x171] sm:$0xff] }
  0x61   : > { %479 = vrot.lane.b32.xlu1 %v3040_v17, %s2611_s29 }
  0x62   : > { %485 = vrot.lane.b32.xlu0 %v397_v18, %s2611_s29  ;;  %v581_v18 = vld [vmem:[#allocation2 + $0xf1] sm:$0xff] }
  0x65   : > { %483 = vrot.lane.b32.xlu1 %v396_v21, %s2611_s29  ;;  %v3112_v21 = vld [vmem:[#allocation2 + $0x129] sm:$0xff] }
  0x66   : > { %489 = vrot.lane.b32.xlu0 %v399_v22, %s2611_s29  ;;  %v583_v22 = vld [vmem:[#allocation2 + $0x111] sm:$0xff] }
  0x69   : > { %487 = vrot.lane.b32.xlu1 %v398_v28, %s2611_s29  ;;  %v3117_v28 = vld [vmem:[#allocation2 + $0x149] sm:$0xff] }
  0x6a   : > { %493 = vrot.lane.b32.xlu0 %v401_v29, %s2611_s29  ;;  %v3120_v29 = vld [vmem:[#allocation2 + $0x131] sm:$0xff] }
  0x6d   : > { %491 = vrot.lane.b32.xlu1 %v400_v30, %s2611_s29  ;;  %v3124_v30 = vld [vmem:[#allocation2 + $0x169] sm:$0xff] }
  0x6e   : > { %497 = vrot.lane.b32.xlu0 %v403_v32, %s2611_s29  ;;  %v3132_v32 = vld [vmem:[#allocation2 + $0x189] sm:$0xff] }
  0x71   : > { %495 = vrot.lane.b32.xlu1 %v402_v34, %s2611_s29  ;;  %v592_v34 = vld [vmem:[#allocation2 + $0x1a9] sm:$0xff] }
  0x72   : > { %630 = vrot.lane.b32.xlu0 %v566_v35, %s2612_s30 }
  0x75   : > { %499 = vrot.lane.b32.xlu1 %v404_v36, %s2611_s29  ;;  %v591_v36 = vld [vmem:[#allocation2 + $0x191] sm:$0xff]  ;;  %s3800_s29 = scalar_lea.hbm %s3854_s3, %s2320_s25 }
  0x76   : > { %634 = vrot.lane.b32.xlu0 %v3078_v37, %s2612_s30 }
  0x79   : > { %632 = vrot.lane.b32.xlu1 %v567_v38, %s2612_s30  ;;  %v594_v38 = vld [vmem:[#allocation2 + $0x1c9] sm:$0xff] }
  0x7a   : > { %638 = vrot.lane.b32.xlu0 %v3083_v39, %s2612_s30 }
  0x7d   : > { %636 = vrot.lane.b32.xlu1 %v3086_v40, %s2612_s30 }
  0x7e   : > { %642 = vrot.lane.b32.xlu0 %v3090_v41, %s2612_s30 }
  0x81   : > { %640 = vrot.lane.b32.xlu1 %v3094_v42, %s2612_s30 }
  0x82   : > { %646 = vrot.lane.b32.xlu0 %v574_v43, %s2612_s30 }
  0x85   : > { %644 = vrot.lane.b32.xlu1 %v3100_v44, %s2612_s30 }
  0x86   : > { %650 = vrot.lane.b32.xlu0 %v576_v45, %s2612_s30  ;;  %v593_v45 = vld [vmem:[#allocation2 + $0x1b1] sm:$0xff] }
  0x88   : > { %v438_v35 = vpop.permute.xlu0 %437 }
  0x89   : > { %648 = vrot.lane.b32.xlu1 %v575_v47, %s2612_s30  ;;  %534 = vst.msk [vmem:[#allocation3] sm:$0xff] %vm533_vm4, %v438_v35 }
  0x8a   : > { %654 = vrot.lane.b32.xlu0 %v578_v48, %s2612_s30  ;;  %v596_v48 = vld [vmem:[#allocation2 + $0x1e9] sm:$0xff] }
  0x8c   : > { %v440_v43 = vpop.permute.xlu0 %439 }
  0x8d   : > { %652 = vrot.lane.b32.xlu1 %v577_v50, %s2612_s30  ;;  %535 = vst.msk [vmem:[#allocation3 + $0x8] sm:$0xff] %vm533_vm4, %v440_v43 }
  0x8e   : > { %658 = vrot.lane.b32.xlu0 %v580_v53, %s2612_s30  ;;  %v595_v53 = vld [vmem:[#allocation2 + $0x1d1] sm:$0xff] }
  0x91   : > { %656 = vrot.lane.b32.xlu1 %v579_v63, %s2612_s30 }
  0x92   : > { %662 = vrot.lane.b32.xlu0 %v582_v14, %s2612_s30 }
  0x95   : > { %660 = vrot.lane.b32.xlu1 %v581_v18, %s2612_s30  ;;  %v597_v18 = vld [vmem:[#allocation2 + $0x1f1] sm:$0xff] }
  0x96   : > { %666 = vrot.lane.b32.xlu0 %v3112_v21, %s2612_s30 }
  0x99   : > { %664 = vrot.lane.b32.xlu1 %v583_v22, %s2612_s30 }
  0x9a   : > { %670 = vrot.lane.b32.xlu0 %v3117_v28, %s2612_s30 }
  0x9d   : > { %668 = vrot.lane.b32.xlu1 %v3120_v29, %s2612_s30 }
  0x9e   : > { %674 = vrot.lane.b32.xlu0 %v3124_v30, %s2612_s30 }
  0xa1   : > { %672 = vrot.lane.b32.xlu1 %v3128_v31, %s2612_s30 }
  0xa2   : > { %678 = vrot.lane.b32.xlu0 %v3132_v32, %s2612_s30 }
  0xa5   : > { %676 = vrot.lane.b32.xlu1 %v3136_v33, %s2612_s30 }
  0xa6   : > { %682 = vrot.lane.b32.xlu0 %v592_v34, %s2612_s30 }
  0xa9   : > { %680 = vrot.lane.b32.xlu1 %v591_v36, %s2612_s30 }
  0xaa   : > { %686 = vrot.lane.b32.xlu0 %v594_v38, %s2612_s30 }
  0xab   : > { %v442_v47 = vpop.permute.xlu1 %441 }
  0xac   : > { %536 = vst.msk [vmem:[#allocation3 + $0x10] sm:$0xff] %vm533_vm4, %v442_v47  ;;  %v446_v50 = vpop.permute.xlu0 %445 }
  0xad   : > { %684 = vrot.lane.b32.xlu1 %v593_v45, %s2612_s30  ;;  %538 = vst.msk [vmem:[#allocation3 + $0x20] sm:$0xff] %vm533_vm4, %v446_v50 }
  0xae   : > { %690 = vrot.lane.b32.xlu0 %v596_v48, %s2612_s30 }
  0xaf   : > { %v444_v63 = vpop.permute.xlu1 %443 }
  0xb0   : > { %537 = vst.msk [vmem:[#allocation3 + $0x18] sm:$0xff] %vm533_vm4, %v444_v63  ;;  %v450_v14 = vpop.permute.xlu0 %449 }
  0xb1   : > { %688 = vrot.lane.b32.xlu1 %v595_v53, %s2612_s30  ;;  %540 = vst.msk [vmem:[#allocation3 + $0x30] sm:$0xff] %vm533_vm4, %v450_v14 }
  0xb2   : > { %823 = vrot.lane.b32.xlu0 %v2921_v46, %s2613_s4 }
  0xb3   : > { %v448_v22 = vpop.permute.xlu1 %447 }
  0xb4   : > { %539 = vst.msk [vmem:[#allocation3 + $0x28] sm:$0xff] %vm533_vm4, %v448_v22  ;;  %v454_v34 = vpop.permute.xlu0 %453 }
  0xb5   : > { %692 = vrot.lane.b32.xlu1 %v597_v18, %s2612_s30  ;;  %542 = vst.msk [vmem:[#allocation3 + $0x40] sm:$0xff] %vm533_vm4, %v454_v34 }
  0xb6   : > { %827 = vrot.lane.b32.xlu0 %v2932_v51, %s2613_s4 }
  0xb7   : > { %v452_v35 = vpop.permute.xlu1 %451 }
  0xb8   : > { %541 = vst.msk [vmem:[#allocation3 + $0x38] sm:$0xff] %vm533_vm4, %v452_v35  ;;  %v458_v36 = vpop.permute.xlu0 %457 }
  0xb9   : > { %825 = vrot.lane.b32.xlu1 %v2928_v49, %s2613_s4  ;;  %544 = vst.msk [vmem:[#allocation3 + $0x50] sm:$0xff] %vm533_vm4, %v458_v36 }
  0xba   : > { %831 = vrot.lane.b32.xlu0 %v2941_v54, %s2613_s4 }
  0xbb   : > { %v456_v46 = vpop.permute.xlu1 %455 }
  0xbc   : > { %543 = vst.msk [vmem:[#allocation3 + $0x48] sm:$0xff] %vm533_vm4, %v456_v46  ;;  %v462_v38 = vpop.permute.xlu0 %461 }
  0xbd   : > { %829 = vrot.lane.b32.xlu1 %v2934_v52, %s2613_s4  ;;  %546 = vst.msk [vmem:[#allocation3 + $0x60] sm:$0xff] %vm533_vm4, %v462_v38  ;;  %v789_v38 = vld [vmem:[#allocation2 + $0x207] sm:$0xff] }
  0xbe   : > { %835 = vrot.lane.b32.xlu0 %v2951_v57, %s2613_s4 }
  0xbf   : > { %v460_v43 = vpop.permute.xlu1 %459 }
  0xc0   : > { %545 = vst.msk [vmem:[#allocation3 + $0x58] sm:$0xff] %vm533_vm4, %v460_v43  ;;  %v466_v49 = vpop.permute.xlu0 %465 }
  0xc1   : > { %833 = vrot.lane.b32.xlu1 %v2943_v55, %s2613_s4  ;;  %548 = vst.msk [vmem:[#allocation3 + $0x70] sm:$0xff] %vm533_vm4, %v466_v49 }
  0xc2   : > { %839 = vrot.lane.b32.xlu0 %v2955_v59, %s2613_s4 }
  0xc3   : > { %v464_v45 = vpop.permute.xlu1 %463 }
  0xc4   : > { %547 = vst.msk [vmem:[#allocation3 + $0x68] sm:$0xff] %vm533_vm4, %v464_v45  ;;  %v470_v47 = vpop.permute.xlu0 %469 }
  0xc5   : > { %837 = vrot.lane.b32.xlu1 %v2953_v58, %s2613_s4  ;;  %550 = vst.msk [vmem:[#allocation3 + $0x80] sm:$0xff] %vm533_vm4, %v470_v47  ;;  %v790_v47 = vld [vmem:[#allocation2 + $0x20f] sm:$0xff] }
  0xc6   : > { %843 = vrot.lane.b32.xlu0 %v2966_v61, %s2613_s4 }
  0xc7   : > { %v468_v48 = vpop.permute.xlu1 %467 }
  0xc8   : > { %549 = vst.msk [vmem:[#allocation3 + $0x78] sm:$0xff] %vm533_vm4, %v468_v48  ;;  %v474_v50 = vpop.permute.xlu0 %473 }
  0xc9   : > { %841 = vrot.lane.b32.xlu1 %v2964_v60, %s2613_s4  ;;  %552 = vst.msk [vmem:[#allocation3 + $0x90] sm:$0xff] %vm533_vm4, %v474_v50 }
  0xca   : > { %847 = vrot.lane.b32.xlu0 %v2976_v0, %s2613_s4 }
  0xcb   : > { %v472_v53 = vpop.permute.xlu1 %471 }
  0xcc   : > { %551 = vst.msk [vmem:[#allocation3 + $0x88] sm:$0xff] %vm533_vm4, %v472_v53  ;;  %v478_v63 = vpop.permute.xlu0 %477 }
  0xcd   : > { %845 = vrot.lane.b32.xlu1 %v2968_v62, %s2613_s4  ;;  %554 = vst.msk [vmem:[#allocation3 + $0xa0] sm:$0xff] %vm533_vm4, %v478_v63 }
  0xce   : > { %851 = vrot.lane.b32.xlu0 %v2980_v2, %s2613_s4 }
  0xcf   : > { %v476_v61 = vpop.permute.xlu1 %475 }
  0xd0   : > { %553 = vst.msk [vmem:[#allocation3 + $0x98] sm:$0xff] %vm533_vm4, %v476_v61  ;;  %v482_v14 = vpop.permute.xlu0 %481 }
  0xd1   : > { %849 = vrot.lane.b32.xlu1 %v2978_v1, %s2613_s4  ;;  %556 = vst.msk [vmem:[#allocation3 + $0xb0] sm:$0xff] %vm533_vm4, %v482_v14 }
  0xd2   : > { %855 = vrot.lane.b32.xlu0 %v2991_v4, %s2613_s4 }
  0xd3   : > { %v480_v0 = vpop.permute.xlu1 %479 }
  0xd4   : > { %555 = vst.msk [vmem:[#allocation3 + $0xa8] sm:$0xff] %vm533_vm4, %v480_v0  ;;  %v486_v62 = vpop.permute.xlu0 %485 }
  0xd5   : > { %853 = vrot.lane.b32.xlu1 %v2989_v3, %s2613_s4  ;;  %558 = vst.msk [vmem:[#allocation3 + $0xc0] sm:$0xff] %vm533_vm4, %v486_v62 }
  0xd6   : > { %859 = vrot.lane.b32.xlu0 %v3001_v6, %s2613_s4 }
  0xd7   : > { %v484_v2 = vpop.permute.xlu1 %483 }
  0xd8   : > { %557 = vst.msk [vmem:[#allocation3 + $0xb8] sm:$0xff] %vm533_vm4, %v484_v2  ;;  %v490_v1 = vpop.permute.xlu0 %489  ;;  %v1954_v2 = vld [vmem:[%s3852_s1 + $0x20] sm:$0xff] }
  0xd9   : > { %857 = vrot.lane.b32.xlu1 %v2993_v5, %s2613_s4  ;;  %560 = vst.msk [vmem:[#allocation3 + $0xd0] sm:$0xff] %vm533_vm4, %v490_v1 }
  0xda   : > { %863 = vrot.lane.b32.xlu0 %v3005_v8, %s2613_s4 }
  0xdb   : > { %v488_v4 = vpop.permute.xlu1 %487 }
  0xdc   : > { %559 = vst.msk [vmem:[#allocation3 + $0xc8] sm:$0xff] %vm533_vm4, %v488_v4  ;;  %v494_v3 = vpop.permute.xlu0 %493 }
  0xdd   : > { %861 = vrot.lane.b32.xlu1 %v3003_v7, %s2613_s4  ;;  %562 = vst.msk [vmem:[#allocation3 + $0xe0] sm:$0xff] %vm533_vm4, %v494_v3  ;;  %v1956_v3 = vld [vmem:[%s3852_s1 + $0x30] sm:$0xff] }
  0xde   : > { %867 = vrot.lane.b32.xlu0 %v3022_v11, %s2613_s4 }
  0xdf   : > { %v492_v18 = vpop.permute.xlu1 %491 }
  0xe0   : > { %561 = vst.msk [vmem:[#allocation3 + $0xd8] sm:$0xff] %vm533_vm4, %v492_v18  ;;  %v498_v5 = vpop.permute.xlu0 %497 }
  0xe1   : > { %865 = vrot.lane.b32.xlu1 %v3015_v9, %s2613_s4  ;;  %564 = vst.msk [vmem:[#allocation3 + $0xf0] sm:$0xff] %vm533_vm4, %v498_v5 }
  0xe2   : > { %871 = vrot.lane.b32.xlu0 %v3036_v15, %s2613_s4 }
  0xe3   : > { %v496_v22 = vpop.permute.xlu1 %495 }
  0xe4   : > { %563 = vst.msk [vmem:[#allocation3 + $0xe8] sm:$0xff] %vm533_vm4, %v496_v22  ;;  %v631_v34 = vpop.permute.xlu0 %630  ;;  %v1533_v22 = vld [vmem:[#allocation2 + $0x50] sm:$0xff] }
  0xe5   : > { %869 = vrot.lane.b32.xlu1 %v3024_v12, %s2613_s4  ;;  %727 = vst.msk [vmem:[#allocation3] sm:$0xff] %vm726_vm5, %v631_v34  ;;  %v1959_v34 = vld [vmem:[%s3852_s1 + $0x48] sm:$0xff] }
  0xe6   : > { %875 = vrot.lane.b32.xlu0 %v3049_v19, %s2613_s4 }
  0xe7   : > { %v500_v35 = vpop.permute.xlu1 %499 }
  0xe8   : > { %565 = vst.msk [vmem:[#allocation3 + $0xf8] sm:$0xff] %vm533_vm4, %v500_v35  ;;  %v635_v36 = vpop.permute.xlu0 %634 }
  0xe9   : > { %873 = vrot.lane.b32.xlu1 %v3038_v16, %s2613_s4  ;;  %729 = vst.msk [vmem:[#allocation3 + $0x10] sm:$0xff] %vm726_vm5, %v635_v36 }
  0xea   : > { %879 = vrot.lane.b32.xlu0 %v3059_v23, %s2613_s4 }
  0xeb   : > { %v633_v46 = vpop.permute.xlu1 %632 }
  0xec   : > { %728 = vst.msk [vmem:[#allocation3 + $0x8] sm:$0xff] %vm726_vm5, %v633_v46  ;;  %v639_v43 = vpop.permute.xlu0 %638 }
  0xed   : > { %877 = vrot.lane.b32.xlu1 %v3051_v20, %s2613_s4  ;;  %731 = vst.msk [vmem:[#allocation3 + $0x20] sm:$0xff] %vm726_vm5, %v639_v43 }
  0xee   : > { %883 = vrot.lane.b32.xlu0 %v789_v38, %s2613_s4  ;;  %v1960_v38 = vld [vmem:[%s3852_s1 + $0x50] sm:$0xff] }
  0xef   : > { %v637_v49 = vpop.permute.xlu1 %636 }
  0xf0   : > { %730 = vst.msk [vmem:[#allocation3 + $0x18] sm:$0xff] %vm726_vm5, %v637_v49  ;;  %v643_v45 = vpop.permute.xlu0 %642 }
  0xf1   : > { %881 = vrot.lane.b32.xlu1 %v3061_v24, %s2613_s4  ;;  %733 = vst.msk [vmem:[#allocation3 + $0x30] sm:$0xff] %vm726_vm5, %v643_v45 }
  0xf2   : > { %1016 = vrot.lane.b32.xlu0 %v2882_v25, %s2614_s5 }
  0xf3   : > { %v641_v23 = vpop.permute.xlu1 %640 }
  0xf4   : > { %732 = vst.msk [vmem:[#allocation3 + $0x28] sm:$0xff] %vm726_vm5, %v641_v23  ;;  %v647_v48 = vpop.permute.xlu0 %646 }
  0xf5   : > { %885 = vrot.lane.b32.xlu1 %v790_v47, %s2613_s4  ;;  %735 = vst.msk [vmem:[#allocation3 + $0x40] sm:$0xff] %vm726_vm5, %v647_v48  ;;  %v1962_v47 = vld [vmem:[%s3852_s1 + $0x60] sm:$0xff] }
  0xf6   : > { %1020 = vrot.lane.b32.xlu0 %v2884_v26, %s2614_s5 }
  0xf7   : > { %v645_v50 = vpop.permute.xlu1 %644 }
  0xf8   : > { %734 = vst.msk [vmem:[#allocation3 + $0x38] sm:$0xff] %vm726_vm5, %v645_v50  ;;  %v651_v24 = vpop.permute.xlu0 %650 }
  0xf9   : > { %1018 = vrot.lane.b32.xlu1 %v2891_v27, %s2614_s5  ;;  %737 = vst.msk [vmem:[#allocation3 + $0x50] sm:$0xff] %vm726_vm5, %v651_v24  ;;  %v1950_v27 = vld [vmem:[%s3852_s1] sm:$0xff]  ;;  %v1964_v24 = vld [vmem:[%s3852_s1 + $0x70] sm:$0xff] }
  0xfa   : > { %1050 = vrot.lane.b32.xlu0 %v3026_v13, %s2614_s5  ;;  %v1951_v13 = vld [vmem:[%s3852_s1 + $0x8] sm:$0xff] }
  0xfb   : > { %v649_v25 = vpop.permute.xlu1 %648  ;;  %v2449_v61 = vpack.c.bf16 %v1951_v13, %v1950_v27 }
  0xfc   : > { %736 = vst.msk [vmem:[#allocation3 + $0x48] sm:$0xff] %vm726_vm5, %v649_v25  ;;  %v655_v53 = vpop.permute.xlu0 %654  ;;  %v1965_v25 = vld [vmem:[%s3852_s1 + $0x78] sm:$0xff] }
  0xfd   : > { %1048 = vrot.lane.b32.xlu1 %v2945_v56, %s2614_s5  ;;  %739 = vst.msk [vmem:[#allocation3 + $0x60] sm:$0xff] %vm726_vm5, %v655_v53  ;;  %2450 = vmatprep.subr.bf16.mxu0 %v2449_v61 }
  0xfe   : > { %1241 = vrot.lane.b32.xlu0 %v3112_v21, %s2615_s6  ;;  %2481 = vmatprep.subr.bf16.mxu1 %v2449_v61  ;;  %v1952_v21 = vld [vmem:[%s3852_s1 + $0x10] sm:$0xff] }
  0xff   : > { %v653_v63 = vpop.permute.xlu1 %652  ;;  %2452 = vmatpush3.bf16.msra.mxu0 %v2449_v61  ;;  %2489 = vmatpush3.bf16.msra.mxu1 %v2449_v61 }
 0x100   : > { %738 = vst.msk [vmem:[#allocation3 + $0x58] sm:$0xff] %vm726_vm5, %v653_v63  ;;  %v659_v56 = vpop.permute.xlu0 %658  ;;  %v2477_v63 = vpack.c.bf16 %v1965_v25, %v1964_v24  ;;  %v1746_v25 = vld [vmem:[#allocation2 + $0x191] sm:$0xff] }
 0x101   : > { %1209 = vrot.lane.b32.xlu1 %v3078_v37, %s2615_s6  ;;  %741 = vst.msk [vmem:[#allocation3 + $0x70] sm:$0xff] %vm726_vm5, %v659_v56  ;;  %v1953_v37 = vld [vmem:[%s3852_s1 + $0x18] sm:$0xff] }
 0x102   : > { %1243 = vrot.lane.b32.xlu0 %v3120_v29, %s2615_s6  ;;  %v2453_v62 = vpack.c.bf16 %v1953_v37, %v1952_v21  ;;  %v1534_v21 = vld [vmem:[#allocation2 + $0x68] sm:$0xff] }
 0x103   : > { %v657_v14 = vpop.permute.xlu1 %656 }
 0x104   : > { %740 = vst.msk [vmem:[#allocation3 + $0x68] sm:$0xff] %vm726_vm5, %v657_v14  ;;  %v663_v0 = vpop.permute.xlu0 %662  ;;  %2454 = vmatprep.subr.bf16.mxu0 %v2453_v62  ;;  %2482 = vmatprep.subr.bf16.mxu1 %v2453_v62 }
 0x105   : > { %1211 = vrot.lane.b32.xlu1 %v3086_v40, %s2615_s6  ;;  %743 = vst.msk [vmem:[#allocation3 + $0x80] sm:$0xff] %vm726_vm5, %v663_v0  ;;  %2456 = vmatpush3.bf16.msra.mxu0 %v2453_v62  ;;  %v1955_v40 = vld [vmem:[%s3852_s1 + $0x28] sm:$0xff] }
 0x106   : > { %1435 = vrot.lane.b32.xlu0 %v3001_v6, %s2616_s24  ;;  %2490 = vmatpush3.bf16.msra.mxu1 %v2453_v62  ;;  %v2457_v4 = vpack.c.bf16 %v1955_v40, %v1954_v2  ;;  %v1550_v0 = vld [vmem:[#allocation2 + $0x168] sm:$0xff]  ;;  %v1551_v2 = vld [vmem:[#allocation2 + $0x170] sm:$0xff] }
 0x107   : > { %v661_v29 = vpop.permute.xlu1 %660 }
 0x108   : > { %742 = vst.msk [vmem:[#allocation3 + $0x78] sm:$0xff] %vm726_vm5, %v661_v29  ;;  %v667_v1 = vpop.permute.xlu0 %666  ;;  %2458 = vmatprep.subr.bf16.mxu0 %v2457_v4  ;;  %2483 = vmatprep.subr.bf16.mxu1 %v2457_v4 }
 0x109   : > { %1403 = vrot.lane.b32.xlu1 %v2932_v51, %s2616_s24  ;;  %745 = vst.msk [vmem:[#allocation3 + $0x90] sm:$0xff] %vm726_vm5, %v667_v1  ;;  %2460 = vmatpush3.bf16.msra.mxu0 %v2457_v4  ;;  %v1957_v51 = vld [vmem:[%s3852_s1 + $0x38] sm:$0xff] }
 0x10a   : > { %1437 = vrot.lane.b32.xlu0 %v3003_v7, %s2616_s24  ;;  %2491 = vmatpush3.bf16.msra.mxu1 %v2457_v4  ;;  %v2461_v5 = vpack.c.bf16 %v1957_v51, %v1956_v3 }
 0x10b   : > { %v665_v6 = vpop.permute.xlu1 %664 }
 0x10c   : > { %744 = vst.msk [vmem:[#allocation3 + $0x88] sm:$0xff] %vm726_vm5, %v665_v6  ;;  %v671_v18 = vpop.permute.xlu0 %670  ;;  %2462 = vmatprep.subr.bf16.mxu0 %v2461_v5  ;;  %2484 = vmatprep.subr.bf16.mxu1 %v2461_v5 }
 0x10d   : > { %1405 = vrot.lane.b32.xlu1 %v2934_v52, %s2616_s24  ;;  %747 = vst.msk [vmem:[#allocation3 + $0xa0] sm:$0xff] %vm726_vm5, %v671_v18  ;;  %2464 = vmatpush3.bf16.msra.mxu0 %v2461_v5  ;;  %v1958_v52 = vld [vmem:[%s3852_s1 + $0x40] sm:$0xff] }
 0x10e   : > { %1628 = vrot.lane.b32.xlu0 %v3017_v10, %s2617_s9  ;;  %2492 = vmatpush3.bf16.msra.mxu1 %v2461_v5  ;;  %v2465_v36 = vpack.c.bf16 %v1959_v34, %v1958_v52  ;;  %v1536_v52 = vld [vmem:[#allocation2 + $0x88] sm:$0xff] }
 0x10f   : > { %v669_v7 = vpop.permute.xlu1 %668 }
 0x110   : > { %746 = vst.msk [vmem:[#allocation3 + $0x98] sm:$0xff] %vm726_vm5, %v669_v7  ;;  %v675_v35 = vpop.permute.xlu0 %674  ;;  %2466 = vmatprep.subr.bf16.mxu0 %v2465_v36  ;;  %2485 = vmatprep.subr.bf16.mxu1 %v2465_v36 }
 0x111   : > { %1596 = vrot.lane.b32.xlu1 %v2884_v26, %s2617_s9  ;;  %749 = vst.msk [vmem:[#allocation3 + $0xb0] sm:$0xff] %vm726_vm5, %v675_v35  ;;  %2468 = vmatpush3.bf16.msra.mxu0 %v2465_v36  ;;  %v1961_v26 = vld [vmem:[%s3852_s1 + $0x58] sm:$0xff]  ;;  %v1552_v35 = vld [vmem:[#allocation2 + $0x188] sm:$0xff] }
 0x112   : > { %1598 = vrot.lane.b32.xlu0 %v1533_v22, %s2617_s9  ;;  %2493 = vmatpush3.bf16.msra.mxu1 %v2465_v36  ;;  %v2469_v49 = vpack.c.bf16 %v1961_v26, %v1960_v38  ;;  %v1553_v26 = vld [vmem:[#allocation2 + $0x190] sm:$0xff] }
 0x113   : > { %v673_v46 = vpop.permute.xlu1 %672 }
 0x114   : > { %748 = vst.msk [vmem:[#allocation3 + $0xa8] sm:$0xff] %vm726_vm5, %v673_v46  ;;  %v679_v43 = vpop.permute.xlu0 %678  ;;  %2470 = vmatprep.subr.bf16.mxu0 %v2469_v49  ;;  %2486 = vmatprep.subr.bf16.mxu1 %v2469_v49 }
 0x115   : > { %1052 = vrot.lane.b32.xlu1 %v3017_v10, %s2614_s5  ;;  %751 = vst.msk [vmem:[#allocation3 + $0xc0] sm:$0xff] %vm726_vm5, %v679_v43  ;;  %2472 = vmatpush3.bf16.msra.mxu0 %v2469_v49  ;;  %v1963_v10 = vld [vmem:[%s3852_s1 + $0x68] sm:$0xff] }
 0x116   : > { %1789 = vrot.lane.b32.xlu0 %v3083_v39, %s2618_s28  ;;  %2494 = vmatpush3.bf16.msra.mxu1 %v2469_v49  ;;  %v2473_v48 = vpack.c.bf16 %v1963_v10, %v1962_v47 }
 0x117   : > { %v677_v45 = vpop.permute.xlu1 %676 }
 0x118   : > { %750 = vst.msk [vmem:[#allocation3 + $0xb8] sm:$0xff] %vm726_vm5, %v677_v45  ;;  %v683_v23 = vpop.permute.xlu0 %682  ;;  %2474 = vmatprep.subr.bf16.mxu0 %v2473_v48  ;;  %2487 = vmatprep.subr.bf16.mxu1 %v2473_v48 }
 0x119   : > { %1630 = vrot.lane.b32.xlu1 %v3040_v17, %s2617_s9  ;;  %753 = vst.msk [vmem:[#allocation3 + $0xd0] sm:$0xff] %vm726_vm5, %v683_v23  ;;  %2476 = vmatpush3.bf16.msra.mxu0 %v2473_v48  ;;  %v1730_v23 = vld [vmem:[#allocation2 + $0x91] sm:$0xff] }
 0x11a   : > { %1022 = vrot.lane.b32.xlu0 %v1533_v22, %s2614_s5  ;;  %2495 = vmatpush3.bf16.msra.mxu1 %v2473_v48 }
 0x11b   : > { %v681_v50 = vpop.permute.xlu1 %680  ;;  %2478 = vmatprep.subr.bf16.mxu0 %v2477_v63  ;;  %2488 = vmatprep.subr.bf16.mxu1 %v2477_v63 }
 0x11c   : > { %752 = vst.msk [vmem:[#allocation3 + $0xc8] sm:$0xff] %vm726_vm5, %v681_v50  ;;  %v687_v53 = vpop.permute.xlu0 %686  ;;  %v1167_v50 = vld [vmem:[#allocation2 + $0x189] sm:$0xff] }
 0x11d   : > { %1821 = vrot.lane.b32.xlu1 %v3117_v28, %s2618_s28  ;;  %755 = vst.msk [vmem:[#allocation3 + $0xe0] sm:$0xff] %vm726_vm5, %v687_v53  ;;  %2480 = vmatpush3.bf16.msra.mxu0 %v2477_v63 }
 0x11e   : > { %1213 = vrot.lane.b32.xlu0 %v3083_v39, %s2615_s6  ;;  %2496 = vmatpush3.bf16.msra.mxu1 %v2477_v63 }
 0x11f   : > { %v685_v27 = vpop.permute.xlu1 %684 }
 0x120   : > { %754 = vst.msk [vmem:[#allocation3 + $0xd8] sm:$0xff] %vm726_vm5, %v685_v27  ;;  %v691_v13 = vpop.permute.xlu0 %690 }
 0x121   : > { %1054 = vrot.lane.b32.xlu1 %v3040_v17, %s2614_s5  ;;  %757 = vst.msk [vmem:[#allocation3 + $0xf0] sm:$0xff] %vm726_vm5, %v691_v13 }
 0x122   : > { %1791 = vrot.lane.b32.xlu0 %v3094_v42, %s2618_s28 }
 0x123   : > { %v689_v56 = vpop.permute.xlu1 %688 }
 0x124   : > { %756 = vst.msk [vmem:[#allocation3 + $0xe8] sm:$0xff] %vm726_vm5, %v689_v56  ;;  %v824_v39 = vpop.permute.xlu0 %823 }
 0x125   : > { %1245 = vrot.lane.b32.xlu1 %v3117_v28, %s2615_s6  ;;  %920 = vst.msk [vmem:[#allocation3] sm:$0xff] %vm919_vm6, %v824_v39  ;;  %v1538_v39 = vld [vmem:[#allocation2 + $0xa8] sm:$0xff] }
 0x126   : > { %1215 = vrot.lane.b32.xlu0 %v3094_v42, %s2615_s6 }
 0x127   : > { %v693_v61 = vpop.permute.xlu1 %692 }
 0x128   : > { %758 = vst.msk [vmem:[#allocation3 + $0xf8] sm:$0xff] %vm726_vm5, %v693_v61  ;;  %v828_v17 = vpop.permute.xlu0 %827 }
 0x129   : > { %1823 = vrot.lane.b32.xlu1 %v3128_v31, %s2618_s28  ;;  %922 = vst.msk [vmem:[#allocation3 + $0x10] sm:$0xff] %vm919_vm6, %v828_v17 }
 0x12a   : > { %1407 = vrot.lane.b32.xlu0 %v2941_v54, %s2616_s24 }
 0x12b   : > { %v826_v14 = vpop.permute.xlu1 %825 }
 0x12c   : > { %921 = vst.msk [vmem:[#allocation3 + $0x8] sm:$0xff] %vm919_vm6, %v826_v14  ;;  %v832_v28 = vpop.permute.xlu0 %831 }
 0x12d   : > { %1247 = vrot.lane.b32.xlu1 %v3128_v31, %s2615_s6  ;;  %924 = vst.msk [vmem:[#allocation3 + $0x20] sm:$0xff] %vm919_vm6, %v832_v28 }
 0x12e   : > { %1409 = vrot.lane.b32.xlu0 %v2943_v55, %s2616_s24 }
 0x12f   : > { %v830_v42 = vpop.permute.xlu1 %829 }
 0x130   : > { %923 = vst.msk [vmem:[#allocation3 + $0x18] sm:$0xff] %vm919_vm6, %v830_v42  ;;  %v836_v37 = vpop.permute.xlu0 %835 }
 0x131   : > { %1439 = vrot.lane.b32.xlu1 %v3005_v8, %s2616_s24  ;;  %926 = vst.msk [vmem:[#allocation3 + $0x30] sm:$0xff] %vm919_vm6, %v836_v37  ;;  %v1535_v8 = vld [vmem:[#allocation2 + $0x70] sm:$0xff] }
 0x132   : > { %1600 = vrot.lane.b32.xlu0 %v1534_v21, %s2617_s9  ;;  %v1555_v37 = vld [vmem:[#allocation2 + $0x1b0] sm:$0xff] }
 0x133   : > { %v834_v54 = vpop.permute.xlu1 %833 }
 0x134   : > { %925 = vst.msk [vmem:[#allocation3 + $0x28] sm:$0xff] %vm919_vm6, %v834_v54  ;;  %v840_v31 = vpop.permute.xlu0 %839 }
 0x135   : > { %1441 = vrot.lane.b32.xlu1 %v3015_v9, %s2616_s24  ;;  %928 = vst.msk [vmem:[#allocation3 + $0x40] sm:$0xff] %vm919_vm6, %v840_v31 }
 0x136   : > { %1024 = vrot.lane.b32.xlu0 %v1534_v21, %s2614_s5 }
 0x137   : > { %v838_v55 = vpop.permute.xlu1 %837 }
 0x138   : > { %927 = vst.msk [vmem:[#allocation3 + $0x38] sm:$0xff] %vm919_vm6, %v838_v55  ;;  %v844_v62 = vpop.permute.xlu0 %843  ;;  %v1747_v55 = vld [vmem:[#allocation2 + $0x1a9] sm:$0xff] }
 0x139   : > { %1632 = vrot.lane.b32.xlu1 %v1550_v0, %s2617_s9  ;;  %930 = vst.msk [vmem:[#allocation3 + $0x50] sm:$0xff] %vm919_vm6, %v844_v62 }
 0x13a   : > { %1602 = vrot.lane.b32.xlu0 %v1535_v8, %s2617_s9 }
 0x13b   : > { %v842_v29 = vpop.permute.xlu1 %841 }
 0x13c   : > { %929 = vst.msk [vmem:[#allocation3 + $0x48] sm:$0xff] %vm919_vm6, %v842_v29  ;;  %v848_v9 = vpop.permute.xlu0 %847 }
 0x13d   : > { %1056 = vrot.lane.b32.xlu1 %v1550_v0, %s2614_s5  ;;  %932 = vst.msk [vmem:[#allocation3 + $0x60] sm:$0xff] %vm919_vm6, %v848_v9 }
 0x13e   : > { %1793 = vrot.lane.b32.xlu0 %v3090_v41, %s2618_s28 }
 0x13f   : > { %v846_v40 = vpop.permute.xlu1 %845 }
 0x140   : > { %931 = vst.msk [vmem:[#allocation3 + $0x58] sm:$0xff] %vm919_vm6, %v846_v40  ;;  %v852_v1 = vpop.permute.xlu0 %851 }
 0x141   : > { %1634 = vrot.lane.b32.xlu1 %v1551_v2, %s2617_s9  ;;  %934 = vst.msk [vmem:[#allocation3 + $0x70] sm:$0xff] %vm919_vm6, %v852_v1 }
 0x142   : > { %1026 = vrot.lane.b32.xlu0 %v1535_v8, %s2614_s5 }
 0x143   : > { %v850_v4 = vpop.permute.xlu1 %849 }
 0x144   : > { %933 = vst.msk [vmem:[#allocation3 + $0x68] sm:$0xff] %vm919_vm6, %v850_v4  ;;  %v856_v6 = vpop.permute.xlu0 %855 }
 0x145   : > { %1825 = vrot.lane.b32.xlu1 %v3124_v30, %s2618_s28  ;;  %936 = vst.msk [vmem:[#allocation3 + $0x80] sm:$0xff] %vm919_vm6, %v856_v6 }
 0x146   : > { %1217 = vrot.lane.b32.xlu0 %v3090_v41, %s2615_s6 }
 0x147   : > { %v854_v3 = vpop.permute.xlu1 %853 }
 0x148   : > { %935 = vst.msk [vmem:[#allocation3 + $0x78] sm:$0xff] %vm919_vm6, %v854_v3  ;;  %v860_v51 = vpop.permute.xlu0 %859  ;;  %v1748_v3 = vld [vmem:[#allocation2 + $0x1b1] sm:$0xff] }
 0x149   : > { %1058 = vrot.lane.b32.xlu1 %v1551_v2, %s2614_s5  ;;  %938 = vst.msk [vmem:[#allocation3 + $0x90] sm:$0xff] %vm919_vm6, %v860_v51  ;;  %v1732_v2 = vld [vmem:[#allocation2 + $0xb1] sm:$0xff] }
 0x14a   : > { %1795 = vrot.lane.b32.xlu0 %v3100_v44, %s2618_s28 }
 0x14b   : > { %v858_v18 = vpop.permute.xlu1 %857 }
 0x14c   : > { %937 = vst.msk [vmem:[#allocation3 + $0x88] sm:$0xff] %vm919_vm6, %v858_v18  ;;  %v864_v5 = vpop.permute.xlu0 %863  ;;  %v1347_v18 = vld [vmem:[#allocation2 + $0xc7] sm:$0xff] }
 0x14d   : > { %1249 = vrot.lane.b32.xlu1 %v3124_v30, %s2615_s6  ;;  %940 = vst.msk [vmem:[#allocation3 + $0xa0] sm:$0xff] %vm919_vm6, %v864_v5 }
 0x14e   : > { %1219 = vrot.lane.b32.xlu0 %v3100_v44, %s2615_s6 }
 0x14f   : > { %v862_v41 = vpop.permute.xlu1 %861 }
 0x150   : > { %939 = vst.msk [vmem:[#allocation3 + $0x98] sm:$0xff] %vm919_vm6, %v862_v41  ;;  %v868_v7 = vpop.permute.xlu0 %867 }
 0x151   : > { %1827 = vrot.lane.b32.xlu1 %v3136_v33, %s2618_s28  ;;  %942 = vst.msk [vmem:[#allocation3 + $0xb0] sm:$0xff] %vm919_vm6, %v868_v7 }
 0x152   : > { %1411 = vrot.lane.b32.xlu0 %v2951_v57, %s2616_s24 }
 0x153   : > { %v866_v22 = vpop.permute.xlu1 %865 }
 0x154   : > { %941 = vst.msk [vmem:[#allocation3 + $0xa8] sm:$0xff] %vm919_vm6, %v866_v22  ;;  %v872_v30 = vpop.permute.xlu0 %871  ;;  %v1348_v22 = vld [vmem:[#allocation2 + $0xcf] sm:$0xff] }
 0x155   : > { %1251 = vrot.lane.b32.xlu1 %v3136_v33, %s2615_s6  ;;  %944 = vst.msk [vmem:[#allocation3 + $0xc0] sm:$0xff] %vm919_vm6, %v872_v30 }
 0x156   : > { %1413 = vrot.lane.b32.xlu0 %v2953_v58, %s2616_s24 }
 0x157   : > { %v870_v44 = vpop.permute.xlu1 %869 }
 0x158   : > { %943 = vst.msk [vmem:[#allocation3 + $0xb8] sm:$0xff] %vm919_vm6, %v870_v44  ;;  %v876_v34 = vpop.permute.xlu0 %875 }
 0x159   : > { %1443 = vrot.lane.b32.xlu1 %v3022_v11, %s2616_s24  ;;  %946 = vst.msk [vmem:[#allocation3 + $0xd0] sm:$0xff] %vm919_vm6, %v876_v34  ;;  %v1537_v11 = vld [vmem:[#allocation2 + $0x90] sm:$0xff] }
 0x15a   : > { %1604 = vrot.lane.b32.xlu0 %v1536_v52, %s2617_s9 }
 0x15b   : > { %v874_v57 = vpop.permute.xlu1 %873 }
 0x15c   : > { %945 = vst.msk [vmem:[#allocation3 + $0xc8] sm:$0xff] %vm919_vm6, %v874_v57  ;;  %v880_v33 = vpop.permute.xlu0 %879 }
 0x15d   : > { %1445 = vrot.lane.b32.xlu1 %v3024_v12, %s2616_s24  ;;  %948 = vst.msk [vmem:[#allocation3 + $0xe0] sm:$0xff] %vm919_vm6, %v880_v33  ;;  %v1729_v12 = vld [vmem:[#allocation2 + $0x89] sm:$0xff] }
 0x15e   : > { %1028 = vrot.lane.b32.xlu0 %v1536_v52, %s2614_s5  ;;  %v1540_v52 = vld [vmem:[#allocation2 + $0xc8] sm:$0xff] }
 0x15f   : > { %v878_v58 = vpop.permute.xlu1 %877 }
 0x160   : > { %947 = vst.msk [vmem:[#allocation3 + $0xd8] sm:$0xff] %vm919_vm6, %v878_v58  ;;  %v884_v36 = vpop.permute.xlu0 %883 }
 0x161   : > { %1636 = vrot.lane.b32.xlu1 %v1552_v35, %s2617_s9  ;;  %950 = vst.msk [vmem:[#allocation3 + $0xf0] sm:$0xff] %vm919_vm6, %v884_v36 }
 0x162   : > { %1606 = vrot.lane.b32.xlu0 %v1537_v11, %s2617_s9 }
 0x163   : > { %v882_v46 = vpop.permute.xlu1 %881 }
 0x164   : > { %949 = vst.msk [vmem:[#allocation3 + $0xe8] sm:$0xff] %vm919_vm6, %v882_v46  ;;  %v1017_v38 = vpop.permute.xlu0 %1016 }
 0x165   : > { %1060 = vrot.lane.b32.xlu1 %v1552_v35, %s2614_s5  ;;  %1113 = vst.msk [vmem:[#allocation3] sm:$0xff] %vm1112_vm7, %v1017_v38  ;;  %v1556_v35 = vld [vmem:[#allocation2 + $0x1c8] sm:$0xff] }
 0x166   : > { %1797 = vrot.lane.b32.xlu0 %v1729_v12, %s2618_s28 }
 0x167   : > { %v886_v43 = vpop.permute.xlu1 %885 }
 0x168   : > { %951 = vst.msk [vmem:[#allocation3 + $0xf8] sm:$0xff] %vm919_vm6, %v886_v43  ;;  %v1021_v49 = vpop.permute.xlu0 %1020 }
 0x169   : > { %1638 = vrot.lane.b32.xlu1 %v1553_v26, %s2617_s9  ;;  %1115 = vst.msk [vmem:[#allocation3 + $0x10] sm:$0xff] %vm1112_vm7, %v1021_v49  ;;  %v1749_v49 = vld [vmem:[#allocation2 + $0x1c9] sm:$0xff] }
 0x16a   : > { %1030 = vrot.lane.b32.xlu0 %v1537_v11, %s2614_s5 }
 0x16b   : > { %v1019_v45 = vpop.permute.xlu1 %1018 }
 0x16c   : > { %1114 = vst.msk [vmem:[#allocation3 + $0x8] sm:$0xff] %vm1112_vm7, %v1019_v45  ;;  %v1051_v47 = vpop.permute.xlu0 %1050 }
 0x16d   : > { %1829 = vrot.lane.b32.xlu1 %v3132_v32, %s2618_s28  ;;  %1130 = vst.msk [vmem:[#allocation3 + $0x88] sm:$0xff] %vm1112_vm7, %v1051_v47 }
 0x16e   : > { %1221 = vrot.lane.b32.xlu0 %v1729_v12, %s2615_s6  ;;  %v1557_v12 = vld [vmem:[#allocation2 + $0x1d0] sm:$0xff] }
 0x16f   : > { %v1049_v10 = vpop.permute.xlu1 %1048 }
 0x170   : > { %1129 = vst.msk [vmem:[#allocation3 + $0x80] sm:$0xff] %vm1112_vm7, %v1049_v10  ;;  %v1242_v48 = vpop.permute.xlu0 %1241 }
 0x171   : > { %1062 = vrot.lane.b32.xlu1 %v1553_v26, %s2614_s5  ;;  %1322 = vst.msk [vmem:[#allocation3 + $0x80] sm:$0xff] %vm1305_vm8, %v1242_v48  ;;  %v1734_v48 = vld [vmem:[#allocation2 + $0xd1] sm:$0xff] }
 0x172   : > { %1799 = vrot.lane.b32.xlu0 %v1730_v23, %s2618_s28 }
 0x173   : > { %v1210_v24 = vpop.permute.xlu1 %1209 }
 0x174   : > { %1306 = vst.msk [vmem:[#allocation3] sm:$0xff] %vm1305_vm8, %v1210_v24  ;;  %v1244_v32 = vpop.permute.xlu0 %1243 }
 0x175   : > { %1253 = vrot.lane.b32.xlu1 %v1167_v50, %s2615_s6  ;;  %1323 = vst.msk [vmem:[#allocation3 + $0x88] sm:$0xff] %vm1305_vm8, %v1244_v32 }
 0x176   : > { %1223 = vrot.lane.b32.xlu0 %v1730_v23, %s2615_s6 }
 0x177   : > { %v1212_v53 = vpop.permute.xlu1 %1211 }
 0x178   : > { %1307 = vst.msk [vmem:[#allocation3 + $0x8] sm:$0xff] %vm1305_vm8, %v1212_v53  ;;  %v1436_v63 = vpop.permute.xlu0 %1435  ;;  %v1750_v53 = vld [vmem:[#allocation2 + $0x1d1] sm:$0xff] }
 0x179   : > { %1831 = vrot.lane.b32.xlu1 %v1746_v25, %s2618_s28  ;;  %1516 = vst.msk [vmem:[#allocation3 + $0x80] sm:$0xff] %vm1499_vm9, %v1436_v63 }
 0x17a   : > { %1415 = vrot.lane.b32.xlu0 %v2955_v59, %s2616_s24 }
 0x17b   : > { %v1404_v27 = vpop.permute.xlu1 %1403 }
 0x17c   : > { %1500 = vst.msk [vmem:[#allocation3] sm:$0xff] %vm1499_vm9, %v1404_v27  ;;  %v1438_v13 = vpop.permute.xlu0 %1437  ;;  %v1349_v27 = vld [vmem:[#allocation2 + $0xe7] sm:$0xff] }
 0x17d   : > { %1255 = vrot.lane.b32.xlu1 %v1746_v25, %s2615_s6  ;;  %1517 = vst.msk [vmem:[#allocation3 + $0x88] sm:$0xff] %vm1499_vm9, %v1438_v13 }
 0x17e   : > { %1417 = vrot.lane.b32.xlu0 %v2964_v60, %s2616_s24  ;;  %v1554_v60 = vld [vmem:[#allocation2 + $0x1a8] sm:$0xff] }
 0x17f   : > { %v1406_v56 = vpop.permute.xlu1 %1405 }
 0x180   : > { %1501 = vst.msk [vmem:[#allocation3 + $0x8] sm:$0xff] %vm1499_vm9, %v1406_v56  ;;  %v1629_v61 = vpop.permute.xlu0 %1628 }
 0x181   : > { %1447 = vrot.lane.b32.xlu1 %v3036_v15, %s2616_s24  ;;  %1709 = vst.msk [vmem:[#allocation3 + $0x80] sm:$0xff] %vm1692_vm10, %v1629_v61  ;;  %v1539_v15 = vld [vmem:[#allocation2 + $0xb0] sm:$0xff] }
 0x182   : > { %1608 = vrot.lane.b32.xlu0 %v1538_v39, %s2617_s9  ;;  %v1350_v61 = vld [vmem:[#allocation2 + $0xef] sm:$0xff] }
 0x183   : > { %v1597_v59 = vpop.permute.xlu1 %1596 }
 0x184   : > { %1693 = vst.msk [vmem:[#allocation3] sm:$0xff] %vm1692_vm10, %v1597_v59  ;;  %v1599_v17 = vpop.permute.xlu0 %1598 }
 0x185   : > { %1449 = vrot.lane.b32.xlu1 %v3038_v16, %s2616_s24  ;;  %1694 = vst.msk [vmem:[#allocation3 + $0x8] sm:$0xff] %vm1692_vm10, %v1599_v17  ;;  %v1731_v16 = vld [vmem:[#allocation2 + $0xa9] sm:$0xff] }
 0x186   : > { %1032 = vrot.lane.b32.xlu0 %v1538_v39, %s2614_s5  ;;  %v1365_v17 = vld [vmem:[#allocation2 + $0x1e7] sm:$0xff] }
 0x187   : > { %v1053_v14 = vpop.permute.xlu1 %1052 }
 0x188   : > { %1131 = vst.msk [vmem:[#allocation3 + $0x90] sm:$0xff] %vm1112_vm7, %v1053_v14  ;;  %v1790_v28 = vpop.permute.xlu0 %1789  ;;  %v1542_v14 = vld [vmem:[#allocation2 + $0xe8] sm:$0xff] }
 0x189   : > { %1640 = vrot.lane.b32.xlu1 %v1554_v60, %s2617_s9  ;;  %1886 = vst.msk [vmem:[#allocation3] sm:$0xff] %vm1885_vm11, %v1790_v28  ;;  %v1366_v28 = vld [vmem:[#allocation2 + $0x1ef] sm:$0xff] }
 0x18a   : > { %1610 = vrot.lane.b32.xlu0 %v1539_v15, %s2617_s9 }
 0x18b   : > { %v1631_v42 = vpop.permute.xlu1 %1630 }
 0x18c   : > { %1710 = vst.msk [vmem:[#allocation3 + $0x88] sm:$0xff] %vm1692_vm10, %v1631_v42  ;;  %v1023_v21 = vpop.permute.xlu0 %1022 }
 0x18d   : > { %1064 = vrot.lane.b32.xlu1 %v1554_v60, %s2614_s5  ;;  %1116 = vst.msk [vmem:[#allocation3 + $0x18] sm:$0xff] %vm1112_vm7, %v1023_v21  ;;  %v1558_v21 = vld [vmem:[#allocation2 + $0x1e8] sm:$0xff] }
 0x18e   : > { %1801 = vrot.lane.b32.xlu0 %v1731_v16, %s2618_s28 }
 0x18f   : > { %v1822_v54 = vpop.permute.xlu1 %1821 }
 0x190   : > { %1902 = vst.msk [vmem:[#allocation3 + $0x80] sm:$0xff] %vm1885_vm11, %v1822_v54  ;;  %v1214_v31 = vpop.permute.xlu0 %1213  ;;  %v1918_v0 = vld [vmem:[#allocation3] sm:$0xff]  ;;  %v1543_v54 = vld [vmem:[#allocation2 + $0xf0] sm:$0xff] }
 0x191   : > { %1642 = vrot.lane.b32.xlu1 %v1555_v37, %s2617_s9  ;;  %1308 = vst.msk [vmem:[#allocation3 + $0x10] sm:$0xff] %vm1305_vm8, %v1214_v31  ;;  %2401 = vmatprep.mubr.f32.mxu0 %v1918_v0 }
 0x192   : > { %1034 = vrot.lane.b32.xlu0 %v1539_v15, %s2614_s5 }
 0x193   : > { %v1055_v8 = vpop.permute.xlu1 %1054 }
 0x194   : > { %1132 = vst.msk [vmem:[#allocation3 + $0x98] sm:$0xff] %vm1112_vm7, %v1055_v8  ;;  %v1792_v62 = vpop.permute.xlu0 %1791 }
 0x195   : > { %1833 = vrot.lane.b32.xlu1 %v1747_v55, %s2618_s28  ;;  %1887 = vst.msk [vmem:[#allocation3 + $0x8] sm:$0xff] %vm1885_vm11, %v1792_v62  ;;  %v1559_v62 = vld [vmem:[#allocation2 + $0x1f0] sm:$0xff] }
 0x196   : > { %1225 = vrot.lane.b32.xlu0 %v1731_v16, %s2615_s6 }
 0x197   : > { %v1246_v29 = vpop.permute.xlu1 %1245  ;;  %v1934_v9 = vld [vmem:[#allocation3 + $0x80] sm:$0xff] }
 0x198   : > { %1324 = vst.msk [vmem:[#allocation3 + $0x90] sm:$0xff] %vm1305_vm8, %v1246_v29  ;;  %2425 = vmatprep.mubr.f32.mxu1 %v1934_v9  ;;  %v1216_v40 = vpop.permute.xlu0 %1215 }
 0x199   : > { %1066 = vrot.lane.b32.xlu1 %v1555_v37, %s2614_s5  ;;  %1309 = vst.msk [vmem:[#allocation3 + $0x18] sm:$0xff] %vm1305_vm8, %v1216_v40  ;;  %v1751_v40 = vld [vmem:[#allocation2 + $0x1e9] sm:$0xff] }
 0x19a   : > { %1803 = vrot.lane.b32.xlu0 %v1732_v2, %s2618_s28 }
 0x19b   : > { %v1824_v1 = vpop.permute.xlu1 %1823 }
 0x19c   : > { %1903 = vst.msk [vmem:[#allocation3 + $0x88] sm:$0xff] %vm1885_vm11, %v1824_v1  ;;  %v1408_v4 = vpop.permute.xlu0 %1407  ;;  %v1919_v6 = vld [vmem:[#allocation3 + $0x8] sm:$0xff] }
 0x19d   : > { %1257 = vrot.lane.b32.xlu1 %v1747_v55, %s2615_s6  ;;  %1502 = vst.msk [vmem:[#allocation3 + $0x10] sm:$0xff] %vm1499_vm9, %v1408_v4  ;;  %2402 = vmatmul.mubr.f32.vlgmr.msra.gmra.mrb[0].mxu0 %v1919_v6  ;;  %v1735_v55 = vld [vmem:[#allocation2 + $0xe9] sm:$0xff] }
 0x19e   : > { %1227 = vrot.lane.b32.xlu0 %v1732_v2, %s2615_s6 }
 0x19f   : > { %v1248_v51 = vpop.permute.xlu1 %1247 }
 0x1a0   : > { %1325 = vst.msk [vmem:[#allocation3 + $0x98] sm:$0xff] %vm1305_vm8, %v1248_v51  ;;  %v1410_v5 = vpop.permute.xlu0 %1409  ;;  %v1736_v51 = vld [vmem:[#allocation2 + $0xf1] sm:$0xff] }
 0x1a1   : > { %1835 = vrot.lane.b32.xlu1 %v1748_v3, %s2618_s28  ;;  %1503 = vst.msk [vmem:[#allocation3 + $0x18] sm:$0xff] %vm1499_vm9, %v1410_v5 }
 0x1a2   : > { %1419 = vrot.lane.b32.xlu0 %v1347_v18, %s2616_s24 }
 0x1a3   : > { %v1440_v41 = vpop.permute.xlu1 %1439  ;;  %v1935_v7 = vld [vmem:[#allocation3 + $0x88] sm:$0xff] }
 0x1a4   : > { %1518 = vst.msk [vmem:[#allocation3 + $0x90] sm:$0xff] %vm1499_vm9, %v1440_v41  ;;  %2426 = vmatmul.mubr.f32.vlgmr.msra.gmra.mrb[0].mxu1 %v1935_v7  ;;  %v1601_v30 = vpop.permute.xlu0 %1600 }
 0x1a5   : > { %1259 = vrot.lane.b32.xlu1 %v1748_v3, %s2615_s6  ;;  %1695 = vst.msk [vmem:[#allocation3 + $0x10] sm:$0xff] %vm1692_vm10, %v1601_v30 }
 0x1a6   : > { %1421 = vrot.lane.b32.xlu0 %v1348_v22, %s2616_s24  ;;  %v1752_v22 = vld [vmem:[#allocation2 + $0x1f1] sm:$0xff] }
 0x1a7   : > { %v1442_v44 = vpop.permute.xlu1 %1441 }
 0x1a8   : > { %1519 = vst.msk [vmem:[#allocation3 + $0x98] sm:$0xff] %vm1499_vm9, %v1442_v44  ;;  %v1025_v34 = vpop.permute.xlu0 %1024  ;;  %v1351_v44 = vld [vmem:[#allocation2 + $0x107] sm:$0xff] }
 0x1a9   : > { %1451 = vrot.lane.b32.xlu1 %v3049_v19, %s2616_s24  ;;  %1117 = vst.msk [vmem:[#allocation3 + $0x20] sm:$0xff] %vm1112_vm7, %v1025_v34  ;;  %v1541_v19 = vld [vmem:[#allocation2 + $0xd0] sm:$0xff] }
 0x1aa   : > { %1612 = vrot.lane.b32.xlu0 %v1540_v52, %s2617_s9 }
 0x1ab   : > { %v1633_v57 = vpop.permute.xlu1 %1632 }
 0x1ac   : > { %1711 = vst.msk [vmem:[#allocation3 + $0x90] sm:$0xff] %vm1692_vm10, %v1633_v57  ;;  %v1603_v33 = vpop.permute.xlu0 %1602 }
 0x1ad   : > { %1453 = vrot.lane.b32.xlu1 %v3051_v20, %s2616_s24  ;;  %1696 = vst.msk [vmem:[#allocation3 + $0x18] sm:$0xff] %vm1692_vm10, %v1603_v33  ;;  %v1733_v20 = vld [vmem:[#allocation2 + $0xc9] sm:$0xff] }
 0x1ae   : > { %1036 = vrot.lane.b32.xlu0 %v1540_v52, %s2614_s5  ;;  %v1352_v33 = vld [vmem:[#allocation2 + $0x10f] sm:$0xff] }
 0x1af   : > { %v1057_v58 = vpop.permute.xlu1 %1056 }
 0x1b0   : > { %1133 = vst.msk [vmem:[#allocation3 + $0xa0] sm:$0xff] %vm1112_vm7, %v1057_v58  ;;  %v1794_v11 = vpop.permute.xlu0 %1793  ;;  %v1367_v58 = vld [vmem:[#allocation2 + $0x207] sm:$0xff] }
 0x1b1   : > { %1644 = vrot.lane.b32.xlu1 %v1556_v35, %s2617_s9  ;;  %1888 = vst.msk [vmem:[#allocation3 + $0x10] sm:$0xff] %vm1885_vm11, %v1794_v11  ;;  %v1544_v11 = vld [vmem:[#allocation2 + $0x108] sm:$0xff] }
 0x1b2   : > { %1614 = vrot.lane.b32.xlu0 %v1541_v19, %s2617_s9 }
 0x1b3   : > { %v1635_v36 = vpop.permute.xlu1 %1634 }
 0x1b4   : > { %1712 = vst.msk [vmem:[#allocation3 + $0x98] sm:$0xff] %vm1692_vm10, %v1635_v36  ;;  %v1027_v46 = vpop.permute.xlu0 %1026 }
 0x1b5   : > { %1068 = vrot.lane.b32.xlu1 %v1556_v35, %s2614_s5  ;;  %1118 = vst.msk [vmem:[#allocation3 + $0x28] sm:$0xff] %vm1112_vm7, %v1027_v46 }
 0x1b6   : > { %1805 = vrot.lane.b32.xlu0 %v1733_v20, %s2618_s28 }
 0x1b7   : > { %v1826_v38 = vpop.permute.xlu1 %1825 }
 0x1b8   : > { %1904 = vst.msk [vmem:[#allocation3 + $0x90] sm:$0xff] %vm1885_vm11, %v1826_v38  ;;  %v1218_v26 = vpop.permute.xlu0 %1217  ;;  %v1920_v43 = vld [vmem:[#allocation3 + $0x10] sm:$0xff]  ;;  %v1560_v38 = vld [vmem:[#allocation2 + $0x208] sm:$0xff] }
 0x1b9   : > { %1646 = vrot.lane.b32.xlu1 %v1557_v12, %s2617_s9  ;;  %1310 = vst.msk [vmem:[#allocation3 + $0x20] sm:$0xff] %vm1305_vm8, %v1218_v26  ;;  %2404 = vmatprep.mubr.f32.mxu0 %v1920_v43  ;;  %v1545_v43 = vld [vmem:[#allocation2 + $0x110] sm:$0xff] }
 0x1ba   : > { %1038 = vrot.lane.b32.xlu0 %v1541_v19, %s2614_s5 }
 0x1bb   : > { %v1059_v45 = vpop.permute.xlu1 %1058 }
 0x1bc   : > { %1134 = vst.msk [vmem:[#allocation3 + $0xa8] sm:$0xff] %vm1112_vm7, %v1059_v45  ;;  %v1796_v47 = vpop.permute.xlu0 %1795 }
 0x1bd   : > { %1837 = vrot.lane.b32.xlu1 %v1749_v49, %s2618_s28  ;;  %1889 = vst.msk [vmem:[#allocation3 + $0x18] sm:$0xff] %vm1885_vm11, %v1796_v47  ;;  %v1737_v47 = vld [vmem:[#allocation2 + $0x109] sm:$0xff] }
 0x1be   : > { %1229 = vrot.lane.b32.xlu0 %v1733_v20, %s2615_s6  ;;  %v1368_v20 = vld [vmem:[#allocation2 + $0x20f] sm:$0xff] }
 0x1bf   : > { %v1250_v10 = vpop.permute.xlu1 %1249  ;;  %v1936_v23 = vld [vmem:[#allocation3 + $0x90] sm:$0xff] }
 0x1c0   : > { %1326 = vst.msk [vmem:[#allocation3 + $0xa0] sm:$0xff] %vm1305_vm8, %v1250_v10  ;;  %2428 = vmatprep.mubr.f32.mxu1 %v1936_v23  ;;  %v1220_v50 = vpop.permute.xlu0 %1219  ;;  %v1561_v23 = vld [vmem:[#allocation2 + $0x210] sm:$0xff] }
 0x1c1   : > { %1070 = vrot.lane.b32.xlu1 %v1557_v12, %s2614_s5  ;;  %1311 = vst.msk [vmem:[#allocation3 + $0x28] sm:$0xff] %vm1305_vm8, %v1220_v50 }
 0x1c2   : > { %1807 = vrot.lane.b32.xlu0 %v1734_v48, %s2618_s28 }
 0x1c3   : > { %v1828_v24 = vpop.permute.xlu1 %1827 }
 0x1c4   : > { %1905 = vst.msk [vmem:[#allocation3 + $0x98] sm:$0xff] %vm1885_vm11, %v1828_v24  ;;  %v1412_v32 = vpop.permute.xlu0 %1411  ;;  %v1921_v25 = vld [vmem:[#allocation3 + $0x18] sm:$0xff] }
 0x1c5   : > { %1261 = vrot.lane.b32.xlu1 %v1749_v49, %s2615_s6  ;;  %1504 = vst.msk [vmem:[#allocation3 + $0x20] sm:$0xff] %vm1499_vm9, %v1412_v32  ;;  %2405 = vmatmul.mubr.f32.gmra.mrb[2].mxu0 %v1921_v25  ;;  %v1753_v32 = vld [vmem:[#allocation2 + $0x209] sm:$0xff] }
 0x1c6   : > { %1231 = vrot.lane.b32.xlu0 %v1734_v48, %s2615_s6 }
 0x1c7   : > { %v1252_v63 = vpop.permute.xlu1 %1251 }
 0x1c8   : > { %1327 = vst.msk [vmem:[#allocation3 + $0xa8] sm:$0xff] %vm1305_vm8, %v1252_v63  ;;  %v1414_v13 = vpop.permute.xlu0 %1413 }
 0x1c9   : > { %1839 = vrot.lane.b32.xlu1 %v1750_v53, %s2618_s28  ;;  %1505 = vst.msk [vmem:[#allocation3 + $0x28] sm:$0xff] %vm1499_vm9, %v1414_v13  ;;  %v1738_v13 = vld [vmem:[#allocation2 + $0x111] sm:$0xff] }
 0x1ca   : > { %1423 = vrot.lane.b32.xlu0 %v1349_v27, %s2616_s24 }
 0x1cb   : > { %v1444_v56 = vpop.permute.xlu1 %1443  ;;  %v1937_v39 = vld [vmem:[#allocation3 + $0x98] sm:$0xff] }
 0x1cc   : > { %1520 = vst.msk [vmem:[#allocation3 + $0xa0] sm:$0xff] %vm1499_vm9, %v1444_v56  ;;  %2429 = vmatmul.mubr.f32.gmra.mrb[2].mxu1 %v1937_v39  ;;  %v1605_v59 = vpop.permute.xlu0 %1604 }
 0x1cd   : > { %1263 = vrot.lane.b32.xlu1 %v1750_v53, %s2615_s6  ;;  %1697 = vst.msk [vmem:[#allocation3 + $0x20] sm:$0xff] %vm1692_vm10, %v1605_v59 }
 0x1ce   : > { %1425 = vrot.lane.b32.xlu0 %v1350_v61, %s2616_s24 }
 0x1cf   : > { %v1446_v60 = vpop.permute.xlu1 %1445 }
 0x1d0   : > { %1521 = vst.msk [vmem:[#allocation3 + $0xa8] sm:$0xff] %vm1499_vm9, %v1446_v60  ;;  %v1029_v15 = vpop.permute.xlu0 %1028 }
 0x1d1   : > { %1455 = vrot.lane.b32.xlu1 %v1365_v17, %s2616_s24  ;;  %1119 = vst.msk [vmem:[#allocation3 + $0x30] sm:$0xff] %vm1112_vm7, %v1029_v15  ;;  %v1754_v17 = vld [vmem:[#allocation2 + $0x211] sm:$0xff] }
 0x1d2   : > { %1616 = vrot.lane.b32.xlu0 %v1542_v14, %s2617_s9 }
 0x1d3   : > { %v1637_v42 = vpop.permute.xlu1 %1636 }
 0x1d4   : > { %1713 = vst.msk [vmem:[#allocation3 + $0xa0] sm:$0xff] %vm1692_vm10, %v1637_v42  ;;  %v1607_v16 = vpop.permute.xlu0 %1606 }
 0x1d5   : > { %1457 = vrot.lane.b32.xlu1 %v1366_v28, %s2616_s24  ;;  %1698 = vst.msk [vmem:[#allocation3 + $0x28] sm:$0xff] %vm1692_vm10, %v1607_v16  ;;  %v1354_v16 = vld [vmem:[#allocation2 + $0x12f] sm:$0xff] }
 0x1d6   : > { %1040 = vrot.lane.b32.xlu0 %v1542_v14, %s2614_s5  ;;  %v1353_v14 = vld [vmem:[#allocation2 + $0x127] sm:$0xff] }
 0x1d7   : > { %v1061_v37 = vpop.permute.xlu1 %1060 }
 0x1d8   : > { %1135 = vst.msk [vmem:[#allocation3 + $0xb0] sm:$0xff] %vm1112_vm7, %v1061_v37  ;;  %v1798_v31 = vpop.permute.xlu0 %1797  ;;  %v1369_v37 = vld [vmem:[#allocation2 + $0x227] sm:$0xff] }
 0x1d9   : > { %1648 = vrot.lane.b32.xlu1 %v1558_v21, %s2617_s9  ;;  %1890 = vst.msk [vmem:[#allocation3 + $0x20] sm:$0xff] %vm1885_vm11, %v1798_v31  ;;  %v1546_v31 = vld [vmem:[#allocation2 + $0x128] sm:$0xff] }
 0x1da   : > { %1618 = vrot.lane.b32.xlu0 %v1543_v54, %s2617_s9 }
 0x1db   : > { %v1639_v0 = vpop.permute.xlu1 %1638 }
 0x1dc   : > { %1714 = vst.msk [vmem:[#allocation3 + $0xa8] sm:$0xff] %vm1692_vm10, %v1639_v0  ;;  %v1031_v8 = vpop.permute.xlu0 %1030 }
 0x1dd   : > { %1072 = vrot.lane.b32.xlu1 %v1558_v21, %s2614_s5  ;;  %1120 = vst.msk [vmem:[#allocation3 + $0x38] sm:$0xff] %vm1112_vm7, %v1031_v8 }
 0x1de   : > { %1809 = vrot.lane.b32.xlu0 %v1735_v55, %s2618_s28 }
 0x1df   : > { %v1830_v29 = vpop.permute.xlu1 %1829 }
 0x1e0   : > { %1906 = vst.msk [vmem:[#allocation3 + $0xa0] sm:$0xff] %vm1885_vm11, %v1830_v29  ;;  %v1222_v9 = vpop.permute.xlu0 %1221  ;;  %v1922_v2 = vld [vmem:[#allocation3 + $0x20] sm:$0xff] }
 0x1e1   : > { %1650 = vrot.lane.b32.xlu1 %v1559_v62, %s2617_s9  ;;  %1312 = vst.msk [vmem:[#allocation3 + $0x30] sm:$0xff] %vm1305_vm8, %v1222_v9  ;;  %2407 = vmatprep.mubr.f32.mxu0 %v1922_v2  ;;  %v1562_v9 = vld [vmem:[#allocation2 + $0x228] sm:$0xff] }
 0x1e2   : > { %1042 = vrot.lane.b32.xlu0 %v1543_v54, %s2614_s5 }
 0x1e3   : > { %v1063_v1 = vpop.permute.xlu1 %1062 }
 0x1e4   : > { %1136 = vst.msk [vmem:[#allocation3 + $0xb8] sm:$0xff] %vm1112_vm7, %v1063_v1  ;;  %v1800_v4 = vpop.permute.xlu0 %1799 }
 0x1e5   : > { %1841 = vrot.lane.b32.xlu1 %v1751_v40, %s2618_s28  ;;  %1891 = vst.msk [vmem:[#allocation3 + $0x28] sm:$0xff] %vm1885_vm11, %v1800_v4  ;;  %v1563_v4 = vld [vmem:[#allocation2 + $0x230] sm:$0xff] }
 0x1e6   : > { %1233 = vrot.lane.b32.xlu0 %v1735_v55, %s2615_s6  ;;  %v1370_v55 = vld [vmem:[#allocation2 + $0x22f] sm:$0xff] }
 0x1e7   : > { %v1254_v6 = vpop.permute.xlu1 %1253  ;;  %v1938_v3 = vld [vmem:[#allocation3 + $0xa0] sm:$0xff] }
 0x1e8   : > { %1328 = vst.msk [vmem:[#allocation3 + $0xb0] sm:$0xff] %vm1305_vm8, %v1254_v6  ;;  %2431 = vmatprep.mubr.f32.mxu1 %v1938_v3  ;;  %v1224_v18 = vpop.permute.xlu0 %1223  ;;  %v1740_v3 = vld [vmem:[#allocation2 + $0x131] sm:$0xff] }
 0x1e9   : > { %1074 = vrot.lane.b32.xlu1 %v1559_v62, %s2614_s5  ;;  %1313 = vst.msk [vmem:[#allocation3 + $0x38] sm:$0xff] %vm1305_vm8, %v1224_v18  ;;  %v1547_v62 = vld [vmem:[#allocation2 + $0x130] sm:$0xff] }
 0x1ea   : > { %1811 = vrot.lane.b32.xlu0 %v1736_v51, %s2618_s28  ;;  %v1755_v18 = vld [vmem:[#allocation2 + $0x229] sm:$0xff] }
 0x1eb   : > { %v1832_v5 = vpop.permute.xlu1 %1831 }
 0x1ec   : > { %1907 = vst.msk [vmem:[#allocation3 + $0xa8] sm:$0xff] %vm1885_vm11, %v1832_v5  ;;  %v1416_v41 = vpop.permute.xlu0 %1415  ;;  %v1923_v7 = vld [vmem:[#allocation3 + $0x28] sm:$0xff] }
 0x1ed   : > { %1265 = vrot.lane.b32.xlu1 %v1751_v40, %s2615_s6  ;;  %1506 = vst.msk [vmem:[#allocation3 + $0x30] sm:$0xff] %vm1499_vm9, %v1416_v41  ;;  %2408 = vmatmul.mubr.f32.gmra.mrb[4].mxu0 %v1923_v7  ;;  %v1739_v40 = vld [vmem:[#allocation2 + $0x129] sm:$0xff] }
 0x1ee   : > { %1235 = vrot.lane.b32.xlu0 %v1736_v51, %s2615_s6 }
 0x1ef   : > { %v1256_v30 = vpop.permute.xlu1 %1255 }
 0x1f0   : > { %1329 = vst.msk [vmem:[#allocation3 + $0xb8] sm:$0xff] %vm1305_vm8, %v1256_v30  ;;  %v1418_v52 = vpop.permute.xlu0 %1417 }
 0x1f1   : > { %1843 = vrot.lane.b32.xlu1 %v1752_v22, %s2618_s28  ;;  %1507 = vst.msk [vmem:[#allocation3 + $0x38] sm:$0xff] %vm1499_vm9, %v1418_v52 }
 0x1f2   : > { %1427 = vrot.lane.b32.xlu0 %v1351_v44, %s2616_s24 }
 0x1f3   : > { %v1448_v34 = vpop.permute.xlu1 %1447  ;;  %v1939_v57 = vld [vmem:[#allocation3 + $0xa8] sm:$0xff] }
 0x1f4   : > { %1522 = vst.msk [vmem:[#allocation3 + $0xb0] sm:$0xff] %vm1499_vm9, %v1448_v34  ;;  %2432 = vmatmul.mubr.f32.gmra.mrb[4].mxu1 %v1939_v57  ;;  %v1609_v35 = vpop.permute.xlu0 %1608 }
 0x1f5   : > { %1267 = vrot.lane.b32.xlu1 %v1752_v22, %s2615_s6  ;;  %1699 = vst.msk [vmem:[#allocation3 + $0x30] sm:$0xff] %vm1692_vm10, %v1609_v35  ;;  %v1756_v22 = vld [vmem:[#allocation2 + $0x231] sm:$0xff] }
 0x1f6   : > { %1429 = vrot.lane.b32.xlu0 %v1352_v33, %s2616_s24 }
 0x1f7   : > { %v1450_v19 = vpop.permute.xlu1 %1449 }
 0x1f8   : > { %1523 = vst.msk [vmem:[#allocation3 + $0xb8] sm:$0xff] %vm1499_vm9, %v1450_v19  ;;  %v1033_v36 = vpop.permute.xlu0 %1032 }
 0x1f9   : > { %1459 = vrot.lane.b32.xlu1 %v1367_v58, %s2616_s24  ;;  %1121 = vst.msk [vmem:[#allocation3 + $0x40] sm:$0xff] %vm1112_vm7, %v1033_v36 }
 0x1fa   : > { %1620 = vrot.lane.b32.xlu0 %v1544_v11, %s2617_s9 }
 0x1fb   : > { %v1641_v46 = vpop.permute.xlu1 %1640 }
 0x1fc   : > { %1715 = vst.msk [vmem:[#allocation3 + $0xb0] sm:$0xff] %vm1692_vm10, %v1641_v46  ;;  %v1611_v12 = vpop.permute.xlu0 %1610 }
 0x1fd   : > { %1461 = vrot.lane.b32.xlu1 %v1368_v20, %s2616_s24  ;;  %1700 = vst.msk [vmem:[#allocation3 + $0x38] sm:$0xff] %vm1692_vm10, %v1611_v12 }
 0x1fe   : > { %1044 = vrot.lane.b32.xlu0 %v1544_v11, %s2614_s5 }
 0x1ff   : > { %v1065_v26 = vpop.permute.xlu1 %1064 }
 0x200   : > { %1137 = vst.msk [vmem:[#allocation3 + $0xc0] sm:$0xff] %vm1112_vm7, %v1065_v26  ;;  %v1802_v49 = vpop.permute.xlu0 %1801 }
 0x201   : > { %1652 = vrot.lane.b32.xlu1 %v1560_v38, %s2617_s9  ;;  %1892 = vst.msk [vmem:[#allocation3 + $0x30] sm:$0xff] %vm1885_vm11, %v1802_v49 }
 0x202   : > { %1622 = vrot.lane.b32.xlu0 %v1545_v43, %s2617_s9 }
 0x203   : > { %v1643_v45 = vpop.permute.xlu1 %1642 }
 0x204   : > { %1716 = vst.msk [vmem:[#allocation3 + $0xb8] sm:$0xff] %vm1692_vm10, %v1643_v45  ;;  %v1035_v10 = vpop.permute.xlu0 %1034 }
 0x205   : > { %1076 = vrot.lane.b32.xlu1 %v1560_v38, %s2614_s5  ;;  %1122 = vst.msk [vmem:[#allocation3 + $0x48] sm:$0xff] %vm1112_vm7, %v1035_v10 }
 0x206   : > { %1813 = vrot.lane.b32.xlu0 %v1737_v47, %s2618_s28 }
 0x207   : > { %v1834_v48 = vpop.permute.xlu1 %1833 }
 0x208   : > { %1908 = vst.msk [vmem:[#allocation3 + $0xb0] sm:$0xff] %vm1885_vm11, %v1834_v48  ;;  %v1226_v50 = vpop.permute.xlu0 %1225  ;;  %v1924_v24 = vld [vmem:[#allocation3 + $0x30] sm:$0xff] }
 0x209   : > { %1654 = vrot.lane.b32.xlu1 %v1561_v23, %s2617_s9  ;;  %1314 = vst.msk [vmem:[#allocation3 + $0x40] sm:$0xff] %vm1305_vm8, %v1226_v50  ;;  %2410 = vmatprep.mubr.f32.mxu0 %v1924_v24 }
 0x20a   : > { %1046 = vrot.lane.b32.xlu0 %v1545_v43, %s2614_s5 }
 0x20b   : > { %v1067_v25 = vpop.permute.xlu1 %1066 }
 0x20c   : > { %1138 = vst.msk [vmem:[#allocation3 + $0xc8] sm:$0xff] %vm1112_vm7, %v1067_v25  ;;  %v1804_v53 = vpop.permute.xlu0 %1803 }
 0x20d   : > { %1845 = vrot.lane.b32.xlu1 %v1753_v32, %s2618_s28  ;;  %1893 = vst.msk [vmem:[#allocation3 + $0x38] sm:$0xff] %vm1885_vm11, %v1804_v53 }
 0x20e   : > { %1237 = vrot.lane.b32.xlu0 %v1737_v47, %s2615_s6 }
 0x20f   : > { %v1258_v63 = vpop.permute.xlu1 %1257  ;;  %v1940_v27 = vld [vmem:[#allocation3 + $0xb0] sm:$0xff] }
 0x210   : > { %1330 = vst.msk [vmem:[#allocation3 + $0xc0] sm:$0xff] %vm1305_vm8, %v1258_v63  ;;  %2434 = vmatprep.mubr.f32.mxu1 %v1940_v27  ;;  %v1228_v56 = vpop.permute.xlu0 %1227 }
 0x211   : > { %1078 = vrot.lane.b32.xlu1 %v1561_v23, %s2614_s5  ;;  %1315 = vst.msk [vmem:[#allocation3 + $0x48] sm:$0xff] %vm1305_vm8, %v1228_v56  ;;  %s161_s5 = sand.u32 1, %s2600_s13  }
 0x212   : > { %1815 = vrot.lane.b32.xlu0 %v1738_v13, %s2618_s28  ;;  %s3809_s16 = scalar_lea.sflag [#allocation5], %s161_s5 }
 0x213   : > { %v1836_v39 = vpop.permute.xlu1 %1835 }
 0x214   : > { %1909 = vst.msk [vmem:[#allocation3 + $0xb8] sm:$0xff] %vm1885_vm11, %v1836_v39  ;;  %v1420_v61 = vpop.permute.xlu0 %1419  ;;  %v1925_v59 = vld [vmem:[#allocation3 + $0x38] sm:$0xff] }
 0x215   : > { %1269 = vrot.lane.b32.xlu1 %v1753_v32, %s2615_s6  ;;  %1508 = vst.msk [vmem:[#allocation3 + $0x40] sm:$0xff] %vm1499_vm9, %v1420_v61  ;;  %2411 = vmatmul.mubr.f32.gmra.mrb[6].mxu0 %v1925_v59 }
 0x216   : > { %1239 = vrot.lane.b32.xlu0 %v1738_v13, %s2615_s6 }
 0x217   : > { %v1260_v60 = vpop.permute.xlu1 %1259 }
 0x218   : > { %1331 = vst.msk [vmem:[#allocation3 + $0xc8] sm:$0xff] %vm1305_vm8, %v1260_v60  ;;  %v1422_v15 = vpop.permute.xlu0 %1421 }
 0x219   : > { %1847 = vrot.lane.b32.xlu1 %v1754_v17, %s2618_s28  ;;  %1509 = vst.msk [vmem:[#allocation3 + $0x48] sm:$0xff] %vm1499_vm9, %v1422_v15  ;;  %v3702_v15 = vld [vmem:[%s3853_s2] ss:$0 sm:$0xff] }
 0x21a   : > { %1431 = vrot.lane.b32.xlu0 %v1353_v14, %s2616_s24 }
 0x21b   : > { %v1452_v28 = vpop.permute.xlu1 %1451  ;;  %v1941_v42 = vld [vmem:[#allocation3 + $0xb8] sm:$0xff] }
 0x21c   : > { %1524 = vst.msk [vmem:[#allocation3 + $0xc0] sm:$0xff] %vm1499_vm9, %v1452_v28  ;;  %2435 = vmatmul.mubr.f32.gmra.mrb[6].mxu1 %v1941_v42  ;;  %v1613_v21 = vpop.permute.xlu0 %1612 }
 0x21d   : > { %1271 = vrot.lane.b32.xlu1 %v1754_v17, %s2615_s6  ;;  %1701 = vst.msk [vmem:[#allocation3 + $0x40] sm:$0xff] %vm1692_vm10, %v1613_v21  ;;  %s2310_s6 = sshll.u32 %s161_s5, 8 }
 0x21e   : > { %1433 = vrot.lane.b32.xlu0 %v1354_v16, %s2616_s24  ;;  %s3709_s20 = scalar_lea.vmem [#allocation4], %s2310_s6 }
 0x21f   : > { %v1454_v54 = vpop.permute.xlu1 %1453  ;;  %s2244_s26 = sshll.u32 %s3709_s20, 4  ;;  %s3803_s26 = int_to_ptr.vmem [resolvable:$true] %s2244_s26 }
 0x220   : > { %1525 = vst.msk [vmem:[#allocation3 + $0xc8] sm:$0xff] %vm1499_vm9, %v1454_v54  ;;  %v1037_v0 = vpop.permute.xlu0 %1036  ;;  %s2546_s4 = scalar_lea.vmem %s3803_s26, 4096  ;;  %p2553_p0 = scmp.lt.s32.totalorder %s3803_s26, %s2551_s8 }
 0x221   : > { %1463 = vrot.lane.b32.xlu1 %v1369_v37, %s2616_s24  ;;  %1123 = vst.msk [vmem:[#allocation3 + $0x50] sm:$0xff] %vm1112_vm7, %v1037_v0  ;;  %p2547_p11 = scmp.ne.s32.totalorder %s3803_s26, %s2546_s4  ;;  %p2554_p1 = scmp.lt.s32.totalorder %s2552_s10, %s2546_s4 }
 0x222   : > { %1624 = vrot.lane.b32.xlu0 %v1546_v31, %s2617_s9 }
 0x223   : > { %v1645_v8 = vpop.permute.xlu1 %1644  ;;  %p2548_p12 = pnand %p2547_p11, %p2679_p5  ;;  %p2555_p2 = por %p2554_p1, %p2553_p0 }
 0x224   : > { %1717 = vst.msk [vmem:[#allocation3 + $0xc0] sm:$0xff] %vm1692_vm10, %v1645_v8  ;;  %v1615_v29 = vpop.permute.xlu0 %1614 }
 0x225   : > { %1465 = vrot.lane.b32.xlu1 %v1370_v55, %s2616_s24  ;;  %1702 = vst.msk [vmem:[#allocation3 + $0x48] sm:$0xff] %vm1692_vm10, %v1615_v29  ;;  %p2549_p13 = pneg %p2548_p12 }
 0x226   : > { %1626 = vrot.lane.b32.xlu0 %v1547_v62, %s2617_s9 }
 0x227   : > { %v1069_v2 = vpop.permute.xlu1 %1068  ;;  %p2556_p3 = pnand %p2555_p2, %p2549_p13 }
 0x228   : > { %1139 = vst.msk [vmem:[#allocation3 + $0xd0] sm:$0xff] %vm1112_vm7, %v1069_v2  ;;  %v1806_v1 = vpop.permute.xlu0 %1805 }
 0x229   : > { %1656 = vrot.lane.b32.xlu1 %v1562_v9, %s2617_s9  ;;  %1894 = vst.msk [vmem:[#allocation3 + $0x40] sm:$0xff] %vm1885_vm11, %v1806_v1 }
 0x22a   : > { %1817 = vrot.lane.b32.xlu0 %v1739_v40, %s2618_s28 }
 0x22b   : > { %v1647_v6 = vpop.permute.xlu1 %1646 }
 0x22c   : > { %1718 = vst.msk [vmem:[#allocation3 + $0xc8] sm:$0xff] %vm1692_vm10, %v1647_v6  ;;  %v1039_v51 = vpop.permute.xlu0 %1038 }
 0x22d   : > { %1658 = vrot.lane.b32.xlu1 %v1563_v4, %s2617_s9  ;;  %1124 = vst.msk [vmem:[#allocation3 + $0x58] sm:$0xff] %vm1112_vm7, %v1039_v51 }
 0x22e   : > { %1819 = vrot.lane.b32.xlu0 %v1740_v3, %s2618_s28 }
 0x22f   : > { %v1838_v5 = vpop.permute.xlu1 %1837 }
 0x230   : > { %1910 = vst.msk [vmem:[#allocation3 + $0xc0] sm:$0xff] %vm1885_vm11, %v1838_v5  ;;  %v1230_v41 = vpop.permute.xlu0 %1229  ;;  %v1926_v7 = vld [vmem:[#allocation3 + $0x40] sm:$0xff] }
 0x231   : > { %1849 = vrot.lane.b32.xlu1 %v1755_v18, %s2618_s28  ;;  %1316 = vst.msk [vmem:[#allocation3 + $0x50] sm:$0xff] %vm1305_vm8, %v1230_v41  ;;  %2413 = vmatprep.mubr.f32.mxu0 %v1926_v7 }
 0x233   : > { %v1071_v30 = vpop.permute.xlu1 %1070 }
 0x234   : > { %1140 = vst.msk [vmem:[#allocation3 + $0xd8] sm:$0xff] %vm1112_vm7, %v1071_v30  ;;  %v1808_v44 = vpop.permute.xlu0 %1807 }
 0x235   : > { %1851 = vrot.lane.b32.xlu1 %v1756_v22, %s2618_s28  ;;  %1895 = vst.msk [vmem:[#allocation3 + $0x48] sm:$0xff] %vm1885_vm11, %v1808_v44 }
 0x237   : > { %v1262_v52 = vpop.permute.xlu1 %1261  ;;  %v1942_v34 = vld [vmem:[#allocation3 + $0xc0] sm:$0xff] }
 0x238   : > { %1332 = vst.msk [vmem:[#allocation3 + $0xd0] sm:$0xff] %vm1305_vm8, %v1262_v52  ;;  %2437 = vmatprep.mubr.f32.mxu1 %v1942_v34  ;;  %v1232_v57 = vpop.permute.xlu0 %1231 }
 0x239   : > { %1317 = vst.msk [vmem:[#allocation3 + $0x58] sm:$0xff] %vm1305_vm8, %v1232_v57 }
 0x23b   : > { %v1840_v33 = vpop.permute.xlu1 %1839 }
 0x23c   : > { %1911 = vst.msk [vmem:[#allocation3 + $0xc8] sm:$0xff] %vm1885_vm11, %v1840_v33  ;;  %v1424_v35 = vpop.permute.xlu0 %1423  ;;  %v1927_v58 = vld [vmem:[#allocation3 + $0x48] sm:$0xff] }
 0x23d   : > { %1510 = vst.msk [vmem:[#allocation3 + $0x50] sm:$0xff] %vm1499_vm9, %v1424_v35  ;;  %2414 = vmatmul.mubr.f32.gmra.mrb[8].mxu0 %v1927_v58 }
 0x23f   : > { %v1264_v19 = vpop.permute.xlu1 %1263 }
 0x240   : > { %1333 = vst.msk [vmem:[#allocation3 + $0xd8] sm:$0xff] %vm1305_vm8, %v1264_v19  ;;  %v1426_v11 = vpop.permute.xlu0 %1425 }
 0x241   : > { %1511 = vst.msk [vmem:[#allocation3 + $0x58] sm:$0xff] %vm1499_vm9, %v1426_v11 }
 0x243   : > { %v1456_v36 = vpop.permute.xlu1 %1455  ;;  %v1943_v20 = vld [vmem:[#allocation3 + $0xc8] sm:$0xff] }
 0x244   : > { %1526 = vst.msk [vmem:[#allocation3 + $0xd0] sm:$0xff] %vm1499_vm9, %v1456_v36  ;;  %2438 = vmatmul.mubr.f32.gmra.mrb[8].mxu1 %v1943_v20  ;;  %v1617_v46 = vpop.permute.xlu0 %1616 }
 0x245   : > { %1703 = vst.msk [vmem:[#allocation3 + $0x50] sm:$0xff] %vm1692_vm10, %v1617_v46 }
 0x247   : > { %v1458_v12 = vpop.permute.xlu1 %1457 }
 0x248   : > { %1527 = vst.msk [vmem:[#allocation3 + $0xd8] sm:$0xff] %vm1499_vm9, %v1458_v12  ;;  %v1041_v38 = vpop.permute.xlu0 %1040 }
 0x249   : > { %1125 = vst.msk [vmem:[#allocation3 + $0x60] sm:$0xff] %vm1112_vm7, %v1041_v38 }
 0x24b   : > { %v1649_v26 = vpop.permute.xlu1 %1648 }
 0x24c   : > { %1719 = vst.msk [vmem:[#allocation3 + $0xd0] sm:$0xff] %vm1692_vm10, %v1649_v26  ;;  %v1619_v43 = vpop.permute.xlu0 %1618 }
 0x24d   : > { %1704 = vst.msk [vmem:[#allocation3 + $0x58] sm:$0xff] %vm1692_vm10, %v1619_v43 }
 0x24f   : > { %v1073_v49 = vpop.permute.xlu1 %1072 }
 0x250   : > { %1141 = vst.msk [vmem:[#allocation3 + $0xe0] sm:$0xff] %vm1112_vm7, %v1073_v49  ;;  %v1810_v45 = vpop.permute.xlu0 %1809 }
 0x251   : > { %1896 = vst.msk [vmem:[#allocation3 + $0x50] sm:$0xff] %vm1885_vm11, %v1810_v45 }
 0x253   : > { %v1651_v47 = vpop.permute.xlu1 %1650 }
 0x254   : > { %1720 = vst.msk [vmem:[#allocation3 + $0xd8] sm:$0xff] %vm1692_vm10, %v1651_v47  ;;  %v1043_v10 = vpop.permute.xlu0 %1042 }
 0x255   : > { %1126 = vst.msk [vmem:[#allocation3 + $0x68] sm:$0xff] %vm1112_vm7, %v1043_v10 }
 0x257   : > { %v1842_v23 = vpop.permute.xlu1 %1841 }
 0x258   : > { %1912 = vst.msk [vmem:[#allocation3 + $0xd0] sm:$0xff] %vm1885_vm11, %v1842_v23  ;;  %v1234_v48 = vpop.permute.xlu0 %1233  ;;  %v1928_v50 = vld [vmem:[#allocation3 + $0x50] sm:$0xff] }
 0x259   : > { %1318 = vst.msk [vmem:[#allocation3 + $0x60] sm:$0xff] %vm1305_vm8, %v1234_v48  ;;  %2416 = vmatprep.mubr.f32.mxu0 %v1928_v50 }
 0x25b   : > { %v1075_v24 = vpop.permute.xlu1 %1074 }
 0x25c   : > { %1142 = vst.msk [vmem:[#allocation3 + $0xe8] sm:$0xff] %vm1112_vm7, %v1075_v24  ;;  %v1812_v32 = vpop.permute.xlu0 %1811 }
 0x25d   : > { %1897 = vst.msk [vmem:[#allocation3 + $0x58] sm:$0xff] %vm1885_vm11, %v1812_v32 }
 0x25f   : > { %v1266_v25 = vpop.permute.xlu1 %1265  ;;  %v1944_v53 = vld [vmem:[#allocation3 + $0xd0] sm:$0xff] }
 0x260   : > { %1334 = vst.msk [vmem:[#allocation3 + $0xe0] sm:$0xff] %vm1305_vm8, %v1266_v25  ;;  %2440 = vmatprep.mubr.f32.mxu1 %v1944_v53  ;;  %v1236_v63 = vpop.permute.xlu0 %1235 }
 0x261   : > { %1319 = vst.msk [vmem:[#allocation3 + $0x68] sm:$0xff] %vm1305_vm8, %v1236_v63 }
 0x263   : > { %v1844_v27 = vpop.permute.xlu1 %1843 }
 0x264   : > { %1913 = vst.msk [vmem:[#allocation3 + $0xd8] sm:$0xff] %vm1885_vm11, %v1844_v27  ;;  %v1428_v13 = vpop.permute.xlu0 %1427  ;;  %v1929_v56 = vld [vmem:[#allocation3 + $0x58] sm:$0xff] }
 0x265   : > { %1512 = vst.msk [vmem:[#allocation3 + $0x60] sm:$0xff] %vm1499_vm9, %v1428_v13  ;;  %2417 = vmatmul.mubr.f32.gmra.mrb[10].mxu0 %v1929_v56 }
 0x267   : > { %v1268_v39 = vpop.permute.xlu1 %1267 }
 0x268   : > { %1335 = vst.msk [vmem:[#allocation3 + $0xe8] sm:$0xff] %vm1305_vm8, %v1268_v39  ;;  %v1430_v61 = vpop.permute.xlu0 %1429 }
 0x269   : > { %1513 = vst.msk [vmem:[#allocation3 + $0x68] sm:$0xff] %vm1499_vm9, %v1430_v61 }
 0x26b   : > { %v1460_v59 = vpop.permute.xlu1 %1459  ;;  %v1945_v17 = vld [vmem:[#allocation3 + $0xd8] sm:$0xff] }
 0x26c   : > { %1528 = vst.msk [vmem:[#allocation3 + $0xe0] sm:$0xff] %vm1499_vm9, %v1460_v59  ;;  %2441 = vmatmul.mubr.f32.gmra.mrb[10].mxu1 %v1945_v17  ;;  %v1621_v60 = vpop.permute.xlu0 %1620 }
 0x26d   : > { %1705 = vst.msk [vmem:[#allocation3 + $0x60] sm:$0xff] %vm1692_vm10, %v1621_v60 }
 0x26f   : > { %v1462_v14 = vpop.permute.xlu1 %1461 }
 0x270   : > { %1529 = vst.msk [vmem:[#allocation3 + $0xe8] sm:$0xff] %vm1499_vm9, %v1462_v14  ;;  %v1045_v28 = vpop.permute.xlu0 %1044  ;;  %v2403_v42 = vpop.f32.mrb[0].mxu0 }
 0x271   : > { %1127 = vst.msk [vmem:[#allocation3 + $0x70] sm:$0xff] %vm1112_vm7, %v1045_v28  ;;  %v2045_v16 = vadd.f32 %v2403_v42, %v3702_v15  ;;  %v2039_v21 = vpop.f32.mrb[1].mxu0 }
 0x272   : > { %v2040_v54 = vadd.f32 %v3702_v15, %v2039_v21 }
 0x273   : > { %v1653_v37 = vpop.permute.xlu1 %1652  ;;  %2199 = vst [vmem:[%s3709_s20 + $0x8] sm:$0xff] %v2045_v16 }
 0x274   : > { %1721 = vst.msk [vmem:[#allocation3 + $0xe0] sm:$0xff] %vm1692_vm10, %v1653_v37  ;;  %2198 = vst [vmem:[%s3709_s20] sm:$0xff] %v2040_v54  ;;  %v1623_v31 = vpop.permute.xlu0 %1622 }
 0x275   : > { %1706 = vst.msk [vmem:[#allocation3 + $0x68] sm:$0xff] %vm1692_vm10, %v1623_v31 }
 0x277   : > { %v2427_v0 = vpop.f32.mrb[0].mxu1  ;;  %v1077_v55 = vpop.permute.xlu1 %1076 }
 0x278   : > { %v2125_v8 = vadd.f32 %v2427_v0, %v3702_v15  ;;  %1143 = vst.msk [vmem:[#allocation3 + $0xf0] sm:$0xff] %vm1112_vm7, %v1077_v55  ;;  %v2119_v62 = vpop.f32.mrb[1].mxu1  ;;  %v1814_v9 = vpop.permute.xlu0 %1813 }
 0x279   : > { %v2120_v29 = vadd.f32 %v3702_v15, %v2119_v62  ;;  %1898 = vst.msk [vmem:[#allocation3 + $0x60] sm:$0xff] %vm1885_vm11, %v1814_v9 }
 0x27a   : > { %2215 = vst [vmem:[%s3709_s20 + $0x88] sm:$0xff] %v2125_v8 }
 0x27b   : > { %2214 = vst [vmem:[%s3709_s20 + $0x80] sm:$0xff] %v2120_v29  ;;  %v1655_v2 = vpop.permute.xlu1 %1654 }
 0x27c   : > { %1722 = vst.msk [vmem:[#allocation3 + $0xe8] sm:$0xff] %vm1692_vm10, %v1655_v2  ;;  %v1047_v40 = vpop.permute.xlu0 %1046 }
 0x27d   : > { %1128 = vst.msk [vmem:[#allocation3 + $0x78] sm:$0xff] %vm1112_vm7, %v1047_v40 }
 0x27f   : > { %v1846_v1 = vpop.permute.xlu1 %1845 }
 0x280   : > { %1914 = vst.msk [vmem:[#allocation3 + $0xe0] sm:$0xff] %vm1885_vm11, %v1846_v1  ;;  %v1238_v4 = vpop.permute.xlu0 %1237  ;;  %v1930_v6 = vld [vmem:[#allocation3 + $0x60] sm:$0xff] }
 0x281   : > { %1320 = vst.msk [vmem:[#allocation3 + $0x70] sm:$0xff] %vm1305_vm8, %v1238_v4  ;;  %2419 = vmatprep.mubr.f32.mxu0 %v1930_v6 }
 0x283   : > { %v1079_v3 = vpop.permute.xlu1 %1078 }
 0x284   : > { %1144 = vst.msk [vmem:[#allocation3 + $0xf8] sm:$0xff] %vm1112_vm7, %v1079_v3  ;;  %v1816_v51 = vpop.permute.xlu0 %1815 }
 0x285   : > { %1899 = vst.msk [vmem:[#allocation3 + $0x68] sm:$0xff] %vm1885_vm11, %v1816_v51 }
 0x287   : > { %v1270_v18 = vpop.permute.xlu1 %1269  ;;  %v1946_v5 = vld [vmem:[#allocation3 + $0xe0] sm:$0xff] }
 0x288   : > { %1336 = vst.msk [vmem:[#allocation3 + $0xf0] sm:$0xff] %vm1305_vm8, %v1270_v18  ;;  %2443 = vmatprep.mubr.f32.mxu1 %v1946_v5  ;;  %v1240_v41 = vpop.permute.xlu0 %1239 }
 0x289   : > { %1321 = vst.msk [vmem:[#allocation3 + $0x78] sm:$0xff] %vm1305_vm8, %v1240_v41 }
 0x28b   : > { %v1848_v7 = vpop.permute.xlu1 %1847 }
 0x28c   : > { %1915 = vst.msk [vmem:[#allocation3 + $0xe8] sm:$0xff] %vm1885_vm11, %v1848_v7  ;;  %v1432_v22 = vpop.permute.xlu0 %1431  ;;  %v1931_v30 = vld [vmem:[#allocation3 + $0x68] sm:$0xff] }
 0x28d   : > { %1514 = vst.msk [vmem:[#allocation3 + $0x70] sm:$0xff] %vm1499_vm9, %v1432_v22  ;;  %2420 = vmatmul.mubr.f32.gmra.mrb[12].mxu0 %v1931_v30 }
 0x28f   : > { %v1272_v44 = vpop.permute.xlu1 %1271 }
 0x290   : > { %1337 = vst.msk [vmem:[#allocation3 + $0xf8] sm:$0xff] %vm1305_vm8, %v1272_v44  ;;  %v1434_v52 = vpop.permute.xlu0 %1433 }
 0x291   : > { %1515 = vst.msk [vmem:[#allocation3 + $0x78] sm:$0xff] %vm1499_vm9, %v1434_v52 }
 0x293   : > { %v1464_v34 = vpop.permute.xlu1 %1463  ;;  %v1947_v57 = vld [vmem:[#allocation3 + $0xe8] sm:$0xff] }
 0x294   : > { %1530 = vst.msk [vmem:[#allocation3 + $0xf0] sm:$0xff] %vm1499_vm9, %v1464_v34  ;;  %2444 = vmatmul.mubr.f32.gmra.mrb[12].mxu1 %v1947_v57  ;;  %v1625_v33 = vpop.permute.xlu0 %1624 }
 0x295   : > { %1707 = vst.msk [vmem:[#allocation3 + $0x70] sm:$0xff] %vm1692_vm10, %v1625_v33 }
 0x297   : > { %v1466_v35 = vpop.permute.xlu1 %1465 }
 0x298   : > { %1531 = vst.msk [vmem:[#allocation3 + $0xf8] sm:$0xff] %vm1499_vm9, %v1466_v35  ;;  %v1627_v58 = vpop.permute.xlu0 %1626  ;;  %v2406_v19 = vpop.f32.mrb[2].mxu0 }
 0x299   : > { %1708 = vst.msk [vmem:[#allocation3 + $0x78] sm:$0xff] %vm1692_vm10, %v1627_v58  ;;  %v2055_v11 = vadd.f32 %v2406_v19, %v3702_v15  ;;  %v2049_v36 = vpop.f32.mrb[3].mxu0 }
 0x29a   : > { %v2050_v46 = vadd.f32 %v3702_v15, %v2049_v36 }
 0x29b   : > { %v1657_v20 = vpop.permute.xlu1 %1656  ;;  %2201 = vst [vmem:[%s3709_s20 + $0x18] sm:$0xff] %v2055_v11 }
 0x29c   : > { %1723 = vst.msk [vmem:[#allocation3 + $0xf0] sm:$0xff] %vm1692_vm10, %v1657_v20  ;;  %2200 = vst [vmem:[%s3709_s20 + $0x10] sm:$0xff] %v2050_v46  ;;  %v1818_v12 = vpop.permute.xlu0 %1817 }
 0x29d   : > { %1900 = vst.msk [vmem:[#allocation3 + $0x70] sm:$0xff] %vm1885_vm11, %v1818_v12 }
 0x29f   : > { %v2430_v38 = vpop.f32.mrb[2].mxu1  ;;  %v1659_v26 = vpop.permute.xlu1 %1658 }
 0x2a0   : > { %v2135_v43 = vadd.f32 %v2430_v38, %v3702_v15  ;;  %1724 = vst.msk [vmem:[#allocation3 + $0xf8] sm:$0xff] %vm1692_vm10, %v1659_v26  ;;  %v2129_v49 = vpop.f32.mrb[3].mxu1  ;;  %v1820_v47 = vpop.permute.xlu0 %1819 }
 0x2a1   : > { %v2130_v45 = vadd.f32 %v3702_v15, %v2129_v49  ;;  %1901 = vst.msk [vmem:[#allocation3 + $0x78] sm:$0xff] %vm1885_vm11, %v1820_v47 }
 0x2a2   : > { %2217 = vst [vmem:[%s3709_s20 + $0x98] sm:$0xff] %v2135_v43 }
 0x2a3   : > { %2216 = vst [vmem:[%s3709_s20 + $0x90] sm:$0xff] %v2130_v45  ;;  %v1850_v10 = vpop.permute.xlu1 %1849 }
 0x2a4   : > { %1916 = vst.msk [vmem:[#allocation3 + $0xf0] sm:$0xff] %vm1885_vm11, %v1850_v10  ;;  %v1932_v23 = vld [vmem:[#allocation3 + $0x70] sm:$0xff] }
 0x2a5   : > { %2422 = vmatprep.mubr.f32.mxu0 %v1932_v23 }
 0x2a7   : > { %v1852_v48 = vpop.permute.xlu1 %1851 }
 0x2a8   : > { %1917 = vst.msk [vmem:[#allocation3 + $0xf8] sm:$0xff] %vm1885_vm11, %v1852_v48  ;;  %v1933_v50 = vld [vmem:[#allocation3 + $0x78] sm:$0xff] }
 0x2a9   : > { %2423 = vmatmul.mubr.f32.gmra.mrb[14].mxu0 %v1933_v50 }
 0x2ab   : > { %v1948_v24 = vld [vmem:[#allocation3 + $0xf0] sm:$0xff] }
 0x2ac   : > { %2446 = vmatprep.mubr.f32.mxu1 %v1948_v24 }
 0x2af   : > { %v1949_v32 = vld [vmem:[#allocation3 + $0xf8] sm:$0xff] }
 0x2b0   : > { %2447 = vmatmul.mubr.f32.gmra.mrb[14].mxu1 %v1949_v32 }
 0x2c0   : > { %v2409_v25 = vpop.f32.mrb[4].mxu0 }
 0x2c1   : > { %v2065_v53 = vadd.f32 %v2409_v25, %v3702_v15  ;;  %v2059_v63 = vpop.f32.mrb[5].mxu0 }
 0x2c2   : > { %v2060_v27 = vadd.f32 %v3702_v15, %v2059_v63 }
 0x2c3   : > { %2203 = vst [vmem:[%s3709_s20 + $0x28] sm:$0xff] %v2065_v53 }
 0x2c4   : > { %2202 = vst [vmem:[%s3709_s20 + $0x20] sm:$0xff] %v2060_v27 }
 0x2c7   : > { %v2433_v13 = vpop.f32.mrb[4].mxu1 }
 0x2c8   : > { %v2145_v56 = vadd.f32 %v2433_v13, %v3702_v15  ;;  %v2139_v39 = vpop.f32.mrb[5].mxu1 }
 0x2c9   : > { %v2140_v61 = vadd.f32 %v3702_v15, %v2139_v39 }
 0x2ca   : > { %2219 = vst [vmem:[%s3709_s20 + $0xa8] sm:$0xff] %v2145_v56 }
 0x2cb   : > { %2218 = vst [vmem:[%s3709_s20 + $0xa0] sm:$0xff] %v2140_v61 }
 0x2e8   : > { %v2412_v59 = vpop.f32.mrb[6].mxu0 }
 0x2e9   : > { %v2075_v17 = vadd.f32 %v2412_v59, %v3702_v15  ;;  %v2069_v60 = vpop.f32.mrb[7].mxu0 }
 0x2ea   : > { %v2070_v14 = vadd.f32 %v3702_v15, %v2069_v60 }
 0x2eb   : > { %2205 = vst [vmem:[%s3709_s20 + $0x38] sm:$0xff] %v2075_v17 }
 0x2ec   : > { %2204 = vst [vmem:[%s3709_s20 + $0x30] sm:$0xff] %v2070_v14 }
 0x2ef   : > { %v2436_v28 = vpop.f32.mrb[6].mxu1 }
 0x2f0   : > { %v2155_v42 = vadd.f32 %v2436_v28, %v3702_v15  ;;  %v2149_v16 = vpop.f32.mrb[7].mxu1 }
 0x2f1   : > { %v2150_v21 = vadd.f32 %v3702_v15, %v2149_v16 }
 0x2f2   : > { %2221 = vst [vmem:[%s3709_s20 + $0xb8] sm:$0xff] %v2155_v42 }
 0x2f3   : > { %2220 = vst [vmem:[%s3709_s20 + $0xb0] sm:$0xff] %v2150_v21 }
 0x310   : > { %v2415_v37 = vpop.f32.mrb[8].mxu0 }
 0x311   : > { %v2085_v54 = vadd.f32 %v2415_v37, %v3702_v15  ;;  %v2079_v31 = vpop.f32.mrb[9].mxu0 }
 0x312   : > { %v2080_v0 = vadd.f32 %v3702_v15, %v2079_v31 }
 0x313   : > { %2207 = vst [vmem:[%s3709_s20 + $0x48] sm:$0xff] %v2085_v54 }
 0x314   : > { %2206 = vst [vmem:[%s3709_s20 + $0x40] sm:$0xff] %v2080_v0 }
 0x317   : > { %v2439_v55 = vpop.f32.mrb[8].mxu1 }
 0x318   : > { %v2165_v8 = vadd.f32 %v2439_v55, %v3702_v15  ;;  %v2159_v62 = vpop.f32.mrb[9].mxu1 }
 0x319   : > { %v2160_v29 = vadd.f32 %v3702_v15, %v2159_v62 }
 0x31a   : > { %2223 = vst [vmem:[%s3709_s20 + $0xc8] sm:$0xff] %v2165_v8 }
 0x31b   : > { %2222 = vst [vmem:[%s3709_s20 + $0xc0] sm:$0xff] %v2160_v29 }
 0x338   : > { %v2418_v9 = vpop.f32.mrb[10].mxu0 }
 0x339   : > { %v2095_v2 = vadd.f32 %v2418_v9, %v3702_v15  ;;  %v2089_v40 = vpop.f32.mrb[11].mxu0 }
 0x33a   : > { %v2090_v1 = vadd.f32 %v3702_v15, %v2089_v40 }
 0x33b   : > { %2209 = vst [vmem:[%s3709_s20 + $0x58] sm:$0xff] %v2095_v2 }
 0x33c   : > { %2208 = vst [vmem:[%s3709_s20 + $0x50] sm:$0xff] %v2090_v1 }
 0x33f   : > { %v2442_v4 = vpop.f32.mrb[10].mxu1 }
 0x340   : > { %v2175_v6 = vadd.f32 %v2442_v4, %v3702_v15  ;;  %v2169_v3 = vpop.f32.mrb[11].mxu1 }
 0x341   : > { %v2170_v51 = vadd.f32 %v3702_v15, %v2169_v3 }
 0x342   : > { %2225 = vst [vmem:[%s3709_s20 + $0xd8] sm:$0xff] %v2175_v6 }
 0x343   : > { %2224 = vst [vmem:[%s3709_s20 + $0xd0] sm:$0xff] %v2170_v51 }
 0x360   : > { %v2421_v18 = vpop.f32.mrb[12].mxu0 }
 0x361   : > { %v2105_v5 = vadd.f32 %v2421_v18, %v3702_v15  ;;  %v2099_v41 = vpop.f32.mrb[13].mxu0 }
 0x362   : > { %v2100_v7 = vadd.f32 %v3702_v15, %v2099_v41 }
 0x363   : > { %2211 = vst [vmem:[%s3709_s20 + $0x68] sm:$0xff] %v2105_v5 }
 0x364   : > { %2210 = vst [vmem:[%s3709_s20 + $0x60] sm:$0xff] %v2100_v7 }
 0x367   : > { %v2445_v22 = vpop.f32.mrb[12].mxu1 }
 0x368   : > { %v2185_v30 = vadd.f32 %v2445_v22, %v3702_v15  ;;  %v2179_v44 = vpop.f32.mrb[13].mxu1 }
 0x369   : > { %v2180_v52 = vadd.f32 %v3702_v15, %v2179_v44 }
 0x36a   : > { %2227 = vst [vmem:[%s3709_s20 + $0xe8] sm:$0xff] %v2185_v30 }
 0x36b   : > { %2226 = vst [vmem:[%s3709_s20 + $0xe0] sm:$0xff] %v2180_v52 }
 0x37c   : > { %v2424_v34 = vpop.f32.mrb[14].mxu0 }
 0x37d   : > { %v2115_v57 = vadd.f32 %v2424_v34, %v3702_v15  ;;  %v2109_v33 = vpop.f32.mrb[15].mxu0 }
 0x37e   : > { %v2110_v35 = vadd.f32 %v3702_v15, %v2109_v33 }
 0x37f   : > { %2213 = vst [vmem:[%s3709_s20 + $0x78] sm:$0xff] %v2115_v57 }
 0x380   : > { %2212 = vst [vmem:[%s3709_s20 + $0x70] sm:$0xff] %v2110_v35 }
 0x383   : > { %v2448_v58 = vpop.f32.mrb[14].mxu1 }
 0x384   : > { %v2195_v19 = vadd.f32 %v2448_v58, %v3702_v15  ;;  %v2189_v11 = vpop.f32.mrb[15].mxu1 }
 0x385   : > { %v2190_v36 = vadd.f32 %v3702_v15, %v2189_v11 }
 0x386   : > { %2229 = vst [vmem:[%s3709_s20 + $0xf8] sm:$0xff] %v2195_v19 }
 0x387   : > { %2228 = vst [vmem:[%s3709_s20 + $0xf0] sm:$0xff] %v2190_v36 }
 0x388   : > { %2559 = shalt.err (!%p2556_p3)
}
 0x389   : > { %s2560_s11 = scalar_lea.hbm %s3800_s29, 4096  ;;  %s2564_s5 = scalar_lea.hbm %s3854_s3, 8192 }
 0x38a   : > { %p2561_p4 = scmp.ne.s32.totalorder %s3800_s29, %s2560_s11  ;;  %p2565_p9 = scmp.lt.u32.totalorder %s3800_s29, %s3854_s3 }
 0x38b   : > { %p2566_p10 = scmp.lt.u32.totalorder %s2564_s5, %s2560_s11  ;;  %p2568_p12 = scmp.lt.u32.totalorder %s2560_s11, %s3800_s29 }
 0x38c   : > { %p2562_p7 = pnand %p2561_p4, %p2679_p5 }
 0x38d   : > { %p2567_p11 = por %p2566_p10, %p2565_p9 }
 0x38e   : > { %p2563_p8 = pneg %p2562_p7 }
 0x38f   : > { %p2569_p13 = por %p2568_p12, %p2567_p11 }
 0x391   : > { %p2570_p0 = pnand %p2569_p13, %p2563_p8 }
 0x393   : > { %2573 = shalt.err (!%p2570_p0)
}
 0x394   : > { %s2620_s9 = smov 128  }
 0x395   : > { %2497 = dma.vmem_to_hbm [thread:$0]  (%p2679_p5), %s3803_s26, 4096, %s3800_s29, %s3809_s16, %s2620_s9, %s2620_s9, %s2612_s30  }
 0x396 PF: > { %p2503_p1 = scmp.ge.s32.totalorder %s2608_s15, 2  ;;  %s2259_s20 = sand.u32 1, %s2596_s12  }
 0x397   : > { %s2260_s25 = scalar_lea.sflag [#allocation5], %s2259_s20 }
 0x398   : > { %p2500_p2 = pnand %p2503_p1, %p2683_p6 }
 0x39a   : > { %2591 = dma.done.wait (!%p2500_p2), %s2260_s25, 4096  }
 0x39b   : > { %2593 = vsyncadd (!%p2500_p2), %s2260_s25, 4294963200  ;;  %p13_p3 = scmp.ge.s32.totalorder %s2666_s18, 4   ;;  %s3857_s12 = smov %s2600_s13 }
 0x39c   : > { %s3858_s13 = smov %s2604_s14  ;;  %s3859_s14 = smov %s2677_s21 }
 0x39d   : > { %s3860_s15 = smov %s2666_s18  ;;  %15 = sbr.rel (!%p13_p3) target bundleno = 3 (0x3), region = 70 }
 0x3a4   :  { %2265 = vsyncpa [#allocation5], 1 }
 0x3a5   :  { %2267 = vsyncpa [#allocation5 + $0x1], 1 }

</bundles_post_ra>
